<compile_context>
chip_gen: v7x
topology: tpu7x:2x2x1
jax: 0.10.0
libtpu: 0.0.40
codegen_flags: <defaults>
</compile_context>

<pallas_src>
import jax
import jax.numpy as jnp
from jax.experimental import pallas as pl
from jax.experimental.pallas import tpu as pltpu


def _round_up(x, m):
    return (x + m - 1) // m * m


def _cdiv(a, b):
    return (a + b - 1) // b


# ---------------------------------------------------------------------------
# Kernel: one decode step, grid = (num_vocab_tiles,)
# ---------------------------------------------------------------------------
def decoder_step_kernel(
    h_ref, c_ref,             # [2, B, Hp] f32 recurrent state (layer 0 / 1), VMEM-resident
    embed_ref,                # [B, Ep]    bf16 dropout(embedding(x))  (dropout = identity in eval)
    w0_ref, b0_ref,           # [Ep+Hp, 4Hp] bf16, [1, 4Hp] f32  layer-0 fused [w_ih; w_hh], b_ih+b_hh
    w1_ref, b1_ref,           # [2Hp,  4Hp] bf16, [1, 4Hp] f32   layer-1 fused weights / bias
    wlin_ref,                 # [Hp, TV] int8 (tile-major storage, leading tile dim squeezed)
    scale_ref, blin_ref,      # [1, TV] f32 per-column dequant scale, [1, TV] f32 bias
    logits_ref,               # [B, TV] bf16 lane-dense logits tile (output)
    h_out_ref, c_out_ref,     # [2, B, Hp] f32 new state (aliased onto h_ref / c_ref)
    m_ref,                    # [B, 1] f32 running row max (VMEM-resident accumulator)
    xh0_sc, xh1_sc, h1_sc,    # bf16 scratch: [B, Ep+Hp], [B, 2Hp], [B, Hp]
):
    j = pl.program_id(0)
    Hp = h_ref.shape[-1]
    Ep = embed_ref.shape[-1]

    def lstm_gates(xh_bf16, c, w_ref, b_ref):
        # PyTorch LSTM gate order (i, f, g, o); each gate occupies a 128-aligned Hp-wide slot.
        gates = jnp.dot(xh_bf16, w_ref[...], preferred_element_type=jnp.float32) + b_ref[...]
        i = jax.nn.sigmoid(gates[:, 0 * Hp:1 * Hp])
        f = jax.nn.sigmoid(gates[:, 1 * Hp:2 * Hp])
        g = jnp.tanh(gates[:, 2 * Hp:3 * Hp])
        o = jax.nn.sigmoid(gates[:, 3 * Hp:4 * Hp])
        c_new = f * c + i * g
        h_new = o * jnp.tanh(c_new)
        return h_new, c_new

    # ---- LSTM step: only on the first vocab tile; results stay resident in VMEM. ----
    @pl.when(j == 0)
    def _lstm_step():
        # Layer 0: fused [x, h0] @ [w_ih0; w_hh0]
        xh0_sc[:, :Ep] = embed_ref[...]
        xh0_sc[:, Ep:] = h_ref[0].astype(jnp.bfloat16)
        h0n, c0n = lstm_gates(xh0_sc[...], c_ref[0], w0_ref, b0_ref)

        # Layer 1: fused [h0n, h1] @ [w_ih1; w_hh1]   (inter-layer dropout = 0.0 default)
        xh1_sc[:, :Hp] = h0n.astype(jnp.bfloat16)
        xh1_sc[:, Hp:] = h_ref[1].astype(jnp.bfloat16)
        h1n, c1n = lstm_gates(xh1_sc[...], c_ref[1], w1_ref, b1_ref)

        h_out_ref[0] = h0n
        h_out_ref[1] = h1n
        c_out_ref[0] = c0n
        c_out_ref[1] = c1n
        h1_sc[...] = h1n.astype(jnp.bfloat16)

        # running-max accumulator for the softmax glue
        m_ref[...] = jnp.full(m_ref.shape, -jnp.inf, dtype=m_ref.dtype)

    # ---- Vocab-tiled projection (every grid step). int8 weights are dequantized post-MXU ----
    w_tile = wlin_ref[...].astype(jnp.bfloat16)
    logits = (jnp.dot(h1_sc[...], w_tile, preferred_element_type=jnp.float32)
              * scale_ref[...] + blin_ref[...])
    logits_ref[...] = logits.astype(logits_ref.dtype)
    m_ref[...] = jnp.maximum(m_ref[...], jnp.max(logits, axis=-1, keepdims=True))


# ---------------------------------------------------------------------------
# One-time parameter preparation (hoisted OUT of the per-token hot path)
# ---------------------------------------------------------------------------
def prepare_decoder_params(params, vocab_tile=None,
                           wlin_tile_budget_bytes=16 * 1024 * 1024,
                           quantize_wlin=True):
    E = params["w_ih0"].shape[1]
    H = params["w_hh0"].shape[1]
    V = params["w_lin"].shape[0]

    Ep = _round_up(E, 128)
    Hp = _round_up(H, 128)
    V128 = _round_up(V, 128)
    wlin_itemsize = 1 if quantize_wlin else 2

    if vocab_tile is None:
        # Double-buffered wlin tile bytes <= budget; cap TV so per-tile logits stay sane.
        tv_max = max(128, (wlin_tile_budget_bytes // (2 * Hp * wlin_itemsize)) // 128 * 128)
        tv_max = min(tv_max, 16384, V128)
        n_tiles = _cdiv(V128, tv_max)
        tv = _round_up(_cdiv(V128, n_tiles), 128)       # minimal over-padding (< 128*n_tiles cols)
    else:
        assert vocab_tile % 128 == 0 and vocab_tile >= 128
        tv = vocab_tile
        n_tiles = _cdiv(V128, tv)
    Vp = n_tiles * tv

    def gate_expand(w_t, in_dim, in_pad):
        # w_t: [in_dim, 4H], gate order (i,f,g,o). Each gate's H columns land at a
        # 128-lane-aligned offset g*Hp so in-kernel gate slices are lane-aligned.
        out = jnp.zeros((in_pad, 4 * Hp), dtype=jnp.float32)
        for g in range(4):
            out = out.at[:in_dim, g * Hp:g * Hp + H].set(w_t[:, g * H:(g + 1) * H])
        return out

    def bias_expand(b):
        out = jnp.zeros((4 * Hp,), dtype=jnp.float32)
        for g in range(4):
            out = out.at[g * Hp:g * Hp + H].set(b[g * H:(g + 1) * H])
        return out.reshape(1, 4 * Hp)

    w0 = jnp.concatenate(
        [gate_expand(params["w_ih0"].T, E, Ep), gate_expand(params["w_hh0"].T, H, Hp)],
        axis=0).astype(jnp.bfloat16)                               # [Ep+Hp, 4Hp]
    b0 = bias_expand(params["b_ih0"] + params["b_hh0"])            # [1, 4Hp] f32
    w1 = jnp.concatenate(
        [gate_expand(params["w_ih1"].T, H, Hp), gate_expand(params["w_hh1"].T, H, Hp)],
        axis=0).astype(jnp.bfloat16)                               # [2Hp, 4Hp]
    b1 = bias_expand(params["b_ih1"] + params["b_hh1"])            # [1, 4Hp] f32

    # Vocab projection: pad, (optionally) int8-quantize with per-column scales, store tile-major.
    wlin_full = jnp.zeros((Hp, Vp), jnp.float32).at[:H, :V].set(params["w_lin"].T)
    if quantize_wlin:
        absmax = jnp.max(jnp.abs(wlin_full), axis=0, keepdims=True)          # [1, Vp]
        scale = jnp.maximum(absmax, 1e-12) / 127.0
        wlin_q = jnp.clip(jnp.round(wlin_full / scale), -127, 127).astype(jnp.int8)
    else:
        scale = jnp.ones((1, Vp), jnp.float32)
        wlin_q = wlin_full.astype(jnp.bfloat16)
    wlin_tiles = wlin_q.reshape(Hp, n_tiles, tv).transpose(1, 0, 2)          # [n_tiles, Hp, tv]

    # Padded vocab columns get a large negative bias (harmless: glue slices to [:V] anyway).
    blin = jnp.full((1, Vp), -1e9, dtype=jnp.float32).at[0, :V].set(params["b_lin"])

    emb = jnp.zeros((params["embedding"].shape[0], Ep), jnp.float32)
    emb = emb.at[:, :E].set(params["embedding"]).astype(jnp.bfloat16)

    return {
        "embedding": emb, "w0": w0, "b0": b0, "w1": w1, "b1": b1,
        "wlin": wlin_tiles, "wlin_scale": scale, "blin": blin,
        "dims": dict(E=E, H=H, V=V, Ep=Ep, Hp=Hp, Vp=Vp, TV=tv, n_tiles=n_tiles,
                     wlin_itemsize=wlin_itemsize),
    }


def _derive_vmem_limit_bytes(dims, batch, single_buffer_resident):
    """VMEM limit derived from actual block shapes (portable to v7x's 64 MiB)."""
    Ep, Hp, TV = dims["Ep"], dims["Hp"], dims["TV"]
    w_item = dims["wlin_itemsize"]
    B = batch
    rbuf = 1 if single_buffer_resident else 2
    resident = rbuf * (
        2 * (2 * B * Hp * 4)              # h, c (f32)
        + B * Ep * 2                      # embed (bf16)
        + (Ep + Hp) * 4 * Hp * 2          # w0 (bf16)
        + (2 * Hp) * 4 * Hp * 2           # w1 (bf16)
        + 2 * (4 * Hp) * 4                # b0, b1 (f32)
    )
    streamed = 2 * (Hp * TV * w_item + 2 * TV * 4 + B * TV * 2)   # wlin + scale/bias + logits
    small_out = 2 * (2 * (2 * B * Hp * 4) + B * 4)                # h', c', m (worst-case 2 bufs)
    scratch = B * (Ep + Hp) * 2 + B * (2 * Hp) * 2 + B * Hp * 2
    est = int((resident + streamed + small_out + scratch) * 1.25) + (2 << 20)
    return max(32 << 20, min(est, 64 << 20))                      # clamp to v7x physical VMEM


# ---------------------------------------------------------------------------
# Persistent padded-state helpers (pad once per decode loop, not per token)
# ---------------------------------------------------------------------------
def pad_decoder_state(hidden, dims):
    h, c = hidden
    H, Hp = dims["H"], dims["Hp"]
    pad = ((0, 0), (0, 0), (0, Hp - H))
    return (jnp.pad(h.astype(jnp.float32), pad), jnp.pad(c.astype(jnp.float32), pad))


def unpad_decoder_state(h_pad, c_pad, dims):
    H = dims["H"]
    return h_pad[:, :, :H], c_pad[:, :, :H]


# ---------------------------------------------------------------------------
# Per-token forward (same semantics as the PyTorch Decoder.forward in eval mode)
# ---------------------------------------------------------------------------
def decoder_forward(x_tokens, h_pad, c_pad, prep, *, single_buffer_resident=True):
    """
    x_tokens: int32 [B, 1]            (seq_len == 1, as in the PyTorch module)
    h_pad/c_pad: float32 [2, B, Hp]   padded recurrent state (see pad_decoder_state)
    returns:  (probs [B, V], h_pad' [2,B,Hp], c_pad' [2,B,Hp])
    """
    d = prep["dims"]
    V, Ep, Hp, Vp, TV = d["V"], d["Ep"], d["Hp"], d["Vp"], d["TV"]
    B = x_tokens.shape[0]

    # glue (fused under jit): embedding gather; nn.Dropout(0.1) in eval mode -> identity.
    embed = prep["embedding"][x_tokens[:, 0]]                      # [B, Ep] bf16

    const2 = lambda j: (0, 0)
    const3 = lambda j: (0, 0, 0)

    # Grid-invariant operands: single-buffered (halves resident-weight VMEM).
    res_kwargs = dict(pipeline_mode=pl.Buffered(1)) if single_buffer_resident else {}

    def res_spec(shape, imap):
        return pl.BlockSpec(shape, imap, **res_kwargs)

    in_specs = [
        res_spec((2, B, Hp), const3),                      # h   (resident)
        res_spec((2, B, Hp), const3),                      # c   (resident)
        res_spec((B, Ep), const2),                         # embed
        res_spec((Ep + Hp, 4 * Hp), const2),               # w0
        res_spec((1, 4 * Hp), const2),                     # b0
        res_spec((2 * Hp, 4 * Hp), const2),                # w1
        res_spec((1, 4 * Hp), const2),                     # b1
        pl.BlockSpec((None, Hp, TV), lambda j: (j, 0, 0)), # wlin int8 tile (tile-major, streamed)
        pl.BlockSpec((1, TV), lambda j: (0, j)),           # per-column dequant scale
        pl.BlockSpec((1, TV), lambda j: (0, j)),           # bias tile
    ]
    out_specs = [
        pl.BlockSpec((B, TV), lambda j: (0, j)),           # logits tile (bf16, lane-dense)
        pl.BlockSpec((2, B, Hp), const3),                  # h'
        pl.BlockSpec((2, B, Hp), const3),                  # c'
        pl.BlockSpec((B, 1), const2),                      # running row max
    ]
    out_shapes = (
        jax.ShapeDtypeStruct((B, Vp), jnp.bfloat16),
        jax.ShapeDtypeStruct((2, B, Hp), jnp.float32),
        jax.ShapeDtypeStruct((2, B, Hp), jnp.float32),
        jax.ShapeDtypeStruct((B, 1), jnp.float32),
    )

    grid_spec = pltpu.PrefetchScalarGridSpec(
        num_scalar_prefetch=0,
        grid=(Vp // TV,),
        in_specs=in_specs,
        out_specs=out_specs,
        scratch_shapes=[
            pltpu.VMEM((B, Ep + Hp), jnp.bfloat16),        # [x, h0]
            pltpu.VMEM((B, 2 * Hp), jnp.bfloat16),         # [h0n, h1]
            pltpu.VMEM((B, Hp), jnp.bfloat16),             # h1n (MXU input for projection)
        ],
    )

    logits, h_out, c_out, m = pl.pallas_call(
        decoder_step_kernel,
        out_shape=out_shapes,
        grid_spec=grid_spec,
        input_output_aliases={0: 1, 1: 2},                 # h_pad -> h', c_pad -> c'
        compiler_params=pltpu.CompilerParams(
            dimension_semantics=("arbitrary",),            # V is a reduction axis (running max)
            vmem_limit_bytes=_derive_vmem_limit_bytes(d, B, single_buffer_resident),
        ),
    )(h_pad, c_pad, embed, prep["w0"], prep["b0"], prep["w1"], prep["b1"],
      prep["wlin"], prep["wlin_scale"], prep["blin"])

    # Final softmax over the tiny [B, V] logits (fused under jit); renormalize by the
    # recomputed sum so rows sum to 1 exactly despite the bf16 logits storage.
    e = jnp.exp(logits[:, :V].astype(jnp.float32) - m)
    probs = e / jnp.sum(e, axis=-1, keepdims=True)
    return probs, h_out, c_out


def make_decoder_step(prep, *, single_buffer_resident=True):
    """Jitted per-token step operating on persistent padded state.
    (For more tokens/step, batch more concurrent decode streams into B: the same weight
    stream amortizes over them at essentially the same per-step wall time.)"""
    def step(x_tokens, h_pad, c_pad):
        return decoder_forward(x_tokens, h_pad, c_pad, prep,
                               single_buffer_resident=single_buffer_resident)
    return jax.jit(step)


# ---------------------------------------------------------------------------
# Pure-JAX reference (PyTorch semantics, f32) and synthetic params
# ---------------------------------------------------------------------------
def decoder_reference(x_tokens, hidden, params):
    h, c = hidden
    x = params["embedding"][x_tokens[:, 0]]

    def cell(x, h, c, w_ih, w_hh, b_ih, b_hh):
        gates = x @ w_ih.T + h @ w_hh.T + b_ih + b_hh
        i, f, g, o = jnp.split(gates, 4, axis=-1)
        c_new = jax.nn.sigmoid(f) * c + jax.nn.sigmoid(i) * jnp.tanh(g)
        h_new = jax.nn.sigmoid(o) * jnp.tanh(c_new)
        return h_new, c_new

    h0n, c0n = cell(x, h[0], c[0], params["w_ih0"], params["w_hh0"],
                    params["b_ih0"], params["b_hh0"])
    h1n, c1n = cell(h0n, h[1], c[1], params["w_ih1"], params["w_hh1"],
                    params["b_ih1"], params["b_hh1"])
    logits = h1n @ params["w_lin"].T + params["b_lin"]
    probs = jax.nn.softmax(logits, axis=-1)
    return probs, (jnp.stack([h0n, h1n]), jnp.stack([c0n, c1n]))


def init_params(key, vocab_size, embedding_size, hidden_size):
    """Deterministic synthetic parameters matching the PyTorch module's shapes."""
    ks = jax.random.split(key, 12)
    k = 1.0 / jnp.sqrt(hidden_size)

    def u(kk, shape):
        return jax.random.uniform(kk, shape, jnp.float32, minval=-k, maxval=k)

    emb = jax.random.normal(ks[0], (vocab_size, embedding_size), jnp.float32)
    emb = emb.at[0].set(0.0)  # padding_idx=0

    return {
        "embedding": emb,
        "w_ih0": u(ks[1], (4 * hidden_size, embedding_size)),
        "w_hh0": u(ks[2], (4 * hidden_size, hidden_size)),
        "b_ih0": u(ks[3], (4 * hidden_size,)),
        "b_hh0": u(ks[4], (4 * hidden_size,)),
        "w_ih1": u(ks[5], (4 * hidden_size, hidden_size)),
        "w_hh1": u(ks[6], (4 * hidden_size, hidden_size)),
        "b_ih1": u(ks[7], (4 * hidden_size,)),
        "b_hh1": u(ks[8], (4 * hidden_size,)),
        "w_lin": u(ks[9], (vocab_size, hidden_size)),
        "b_lin": u(ks[10], (vocab_size,)),
    }


if __name__ == "__main__":
    # Small shapes consistent with the module's forward (seq_len = 1).
    B, E, H, V, L = 8, 32, 32, 200, 2

    key = jax.random.PRNGKey(0)
    kp, kx, kh, kc = jax.random.split(key, 4)

    params = init_params(kp, vocab_size=V, embedding_size=E, hidden_size=H)
    # One-time prep (transposes / gate fusion / padding / int8 quantization hoisted out of the
    # decode step). vocab_tile=128 keeps >1 vocab tiles at this toy size so the grid is exercised.
    prep = prepare_decoder_params(params, vocab_tile=128)

    x = jax.random.randint(kx, (B, 1), minval=0, maxval=V, dtype=jnp.int32)  # [batch, seq_len=1]
    h0 = jax.random.normal(kh, (L, B, H), jnp.float32)
    c0 = jax.random.normal(kc, (L, B, H), jnp.float32)

    # Pad the recurrent state ONCE (it would stay padded across a whole decode loop).
    h_pad, c_pad = pad_decoder_state((h0, c0), prep["dims"])

    try:
        step = make_decoder_step(prep, single_buffer_resident=True)
        probs, h_new_p, c_new_p = step(x, h_pad, c_pad)
        jax.block_until_ready((probs, h_new_p, c_new_p))
    except Exception:
        # TODO(synk): pipeline_mode=pl.Buffered(1) not supported by this jax version;
        # fall back to default double-buffered resident operands.
        step = make_decoder_step(prep, single_buffer_resident=False)
        probs, h_new_p, c_new_p = step(x, h_pad, c_pad)
        jax.block_until_ready((probs, h_new_p, c_new_p))

    h_new, c_new = unpad_decoder_state(h_new_p, c_new_p, prep["dims"])

    assert probs.shape == (B, V)
    assert h_new.shape == (L, B, H) and c_new.shape == (L, B, H)
    # softmax rows sum to 1
    assert bool(jnp.allclose(jnp.sum(probs, axis=-1), 1.0, atol=1e-4))

    # compare against the f32 pure-JAX reference (bf16 gates + int8 w_lin -> loose tolerance)
    probs_ref, (h_r, c_r) = decoder_reference(x, (h0, c0), params)
    assert bool(jnp.allclose(probs, probs_ref, atol=1e-2))
    assert bool(jnp.allclose(h_new, h_r, atol=5e-2))
    assert bool(jnp.allclose(c_new, c_r, atol=5e-2))

    print("KERNEL_OK")
</pallas_src>

<mosaic_0001>
module attributes {stable_mosaic.version = 11 : i64} {
  func.func @decoder_step_kernel(%arg0: i32, %arg1: memref<2x8x128xf32, #tpu.memory_space<vmem>>, %arg2: memref<2x8x128xf32, #tpu.memory_space<vmem>>, %arg3: memref<8x128xbf16, #tpu.memory_space<vmem>>, %arg4: memref<256x512xbf16, #tpu.memory_space<vmem>>, %arg5: memref<1x512xf32, #tpu.memory_space<vmem>>, %arg6: memref<256x512xbf16, #tpu.memory_space<vmem>>, %arg7: memref<1x512xf32, #tpu.memory_space<vmem>>, %arg8: memref<1x128x128xi8, #tpu.memory_space<vmem>>, %arg9: memref<1x128xf32, #tpu.memory_space<vmem>>, %arg10: memref<1x128xf32, #tpu.memory_space<vmem>>, %arg11: memref<8x128xbf16, #tpu.memory_space<vmem>>, %arg12: memref<2x8x128xf32, #tpu.memory_space<vmem>>, %arg13: memref<2x8x128xf32, #tpu.memory_space<vmem>>, %arg14: memref<8x1xf32, #tpu.memory_space<vmem>>, %arg15: memref<8x256xbf16, #tpu.memory_space<vmem>>, %arg16: memref<8x256xbf16, #tpu.memory_space<vmem>>, %arg17: memref<8x128xbf16, #tpu.memory_space<vmem>>) attributes {dimension_semantics = [#tpu.dimension_semantics<arbitrary>], iteration_bounds = array<i64: 2>, scalar_prefetch = 0 : i64, scratch_operands = 3 : i64, tpu.core_type = #tpu.core_type<tc>, window_params = [{pipeline_mode = #tpu.pipeline_mode<synchronous>, transform_indices = @transform_0, window_bounds = array<i64: 2, 8, 128>}, {pipeline_mode = #tpu.pipeline_mode<synchronous>, transform_indices = @transform_1, window_bounds = array<i64: 2, 8, 128>}, {pipeline_mode = #tpu.pipeline_mode<synchronous>, transform_indices = @transform_2, window_bounds = array<i64: 8, 128>}, {pipeline_mode = #tpu.pipeline_mode<synchronous>, transform_indices = @transform_3, window_bounds = array<i64: 256, 512>}, {pipeline_mode = #tpu.pipeline_mode<synchronous>, transform_indices = @transform_4, window_bounds = array<i64: 1, 512>}, {pipeline_mode = #tpu.pipeline_mode<synchronous>, transform_indices = @transform_5, window_bounds = array<i64: 256, 512>}, {pipeline_mode = #tpu.pipeline_mode<synchronous>, transform_indices = @transform_6, window_bounds = array<i64: 1, 512>}, {transform_indices = @transform_7, window_bounds = array<i64: 1, 128, 128>}, {transform_indices = @transform_8, window_bounds = array<i64: 1, 128>}, {transform_indices = @transform_9, window_bounds = array<i64: 1, 128>}, {transform_indices = @transform_10, window_bounds = array<i64: 8, 128>}, {pipeline_mode = #tpu.pipeline_mode<synchronous>, transform_indices = @transform_11, window_bounds = array<i64: 2, 8, 128>}, {pipeline_mode = #tpu.pipeline_mode<synchronous>, transform_indices = @transform_12, window_bounds = array<i64: 2, 8, 128>}, {pipeline_mode = #tpu.pipeline_mode<synchronous>, transform_indices = @transform_13, window_bounds = array<i64: 8, 1>}]} {
    %c0_i32 = arith.constant 0 : i32
    %0 = arith.cmpi eq, %arg0, %c0_i32 : i32
    %1 = arith.extui %0 : i1 to i32
    %c0_i32_0 = arith.constant 0 : i32
    %2 = arith.cmpi ne, %1, %c0_i32_0 : i32
    scf.if %2 {
      %c0_16 = arith.constant 0 : index
      %c0_17 = arith.constant 0 : index
      %21 = vector.load %arg3[%c0_16, %c0_17] : memref<8x128xbf16, #tpu.memory_space<vmem>>, vector<8x128xbf16>
      %c0_18 = arith.constant 0 : index
      %c0_19 = arith.constant 0 : index
      %22 = vector.load %arg15[%c0_18, %c0_19] : memref<8x256xbf16, #tpu.memory_space<vmem>>, vector<8x128xbf16>
      tpu.vector_store %arg15[%c0_18, %c0_19], %21 {strides = array<i32>} : memref<8x256xbf16, #tpu.memory_space<vmem>>, vector<8x128xbf16>,
      %c0_20 = arith.constant 0 : index
      %c0_21 = arith.constant 0 : index
      %c0_22 = arith.constant 0 : index
      %23 = vector.load %arg1[%c0_20, %c0_21, %c0_22] : memref<2x8x128xf32, #tpu.memory_space<vmem>>, vector<1x8x128xf32>
      %24 = vector.shape_cast %23 : vector<1x8x128xf32> to vector<8x128xf32>
      %25 = arith.truncf %24 : vector<8x128xf32> to vector<8x128xbf16>
      %c0_23 = arith.constant 0 : index
      %c128 = arith.constant 128 : index
      %26 = vector.load %arg15[%c0_23, %c128] : memref<8x256xbf16, #tpu.memory_space<vmem>>, vector<8x128xbf16>
      tpu.vector_store %arg15[%c0_23, %c128], %25 {strides = array<i32>} : memref<8x256xbf16, #tpu.memory_space<vmem>>, vector<8x128xbf16>,
      %c0_24 = arith.constant 0 : index
      %c0_25 = arith.constant 0 : index
      %27 = vector.load %arg15[%c0_24, %c0_25] : memref<8x256xbf16, #tpu.memory_space<vmem>>, vector<8x256xbf16>
      %c0_26 = arith.constant 0 : index
      %c0_27 = arith.constant 0 : index
      %c0_28 = arith.constant 0 : index
      %28 = vector.load %arg2[%c0_26, %c0_27, %c0_28] : memref<2x8x128xf32, #tpu.memory_space<vmem>>, vector<1x8x128xf32>
      %29 = vector.shape_cast %28 : vector<1x8x128xf32> to vector<8x128xf32>
      %c0_29 = arith.constant 0 : index
      %c0_30 = arith.constant 0 : index
      %30 = vector.load %arg4[%c0_29, %c0_30] : memref<256x512xbf16, #tpu.memory_space<vmem>>, vector<256x512xbf16>
      %cst_31 = arith.constant dense<0.000000e+00> : vector<8x512xf32>
      %31 = tpu.matmul %27, %30, %cst_31 {dimension_numbers = #tpu.dot_dimension_numbers<[1], [0], [0], [1], [0, 0, 1, 1], [], []>} : vector<8x256xbf16>, vector<256x512xbf16>, vector<8x512xf32> -> vector<8x512xf32>
      %c0_32 = arith.constant 0 : index
      %c0_33 = arith.constant 0 : index
      %32 = vector.load %arg5[%c0_32, %c0_33] : memref<1x512xf32, #tpu.memory_space<vmem>>, vector<1x512xf32>
      %33 = vector.broadcast %32 : vector<1x512xf32> to vector<8x512xf32>
      %34 = arith.addf %31, %33 : vector<8x512xf32>
      %35 = vector.extract_strided_slice %34 {offsets = [0, 0], sizes = [8, 128], strides = [1, 1]} : vector<8x512xf32> to vector<8x128xf32>
      %36 = arith.negf %35 : vector<8x128xf32>
      %37 = math.exp %36 : vector<8x128xf32>
      %cst_34 = arith.constant 1.000000e+00 : f32
      %38 = vector.broadcast %cst_34 : f32 to vector<8x128xf32>
      %39 = arith.addf %38, %37 : vector<8x128xf32>
      %40 = arith.divf %38, %39 : vector<8x128xf32>
      %41 = vector.extract_strided_slice %34 {offsets = [0, 128], sizes = [8, 128], strides = [1, 1]} : vector<8x512xf32> to vector<8x128xf32>
      %42 = arith.negf %41 : vector<8x128xf32>
      %43 = math.exp %42 : vector<8x128xf32>
      %cst_35 = arith.constant 1.000000e+00 : f32
      %44 = vector.broadcast %cst_35 : f32 to vector<8x128xf32>
      %45 = arith.addf %44, %43 : vector<8x128xf32>
      %46 = arith.divf %44, %45 : vector<8x128xf32>
      %47 = vector.extract_strided_slice %34 {offsets = [0, 256], sizes = [8, 128], strides = [1, 1]} : vector<8x512xf32> to vector<8x128xf32>
      %48 = math.tanh %47 : vector<8x128xf32>
      %49 = vector.extract_strided_slice %34 {offsets = [0, 384], sizes = [8, 128], strides = [1, 1]} : vector<8x512xf32> to vector<8x128xf32>
      %50 = arith.negf %49 : vector<8x128xf32>
      %51 = math.exp %50 : vector<8x128xf32>
      %cst_36 = arith.constant 1.000000e+00 : f32
      %52 = vector.broadcast %cst_36 : f32 to vector<8x128xf32>
      %53 = arith.addf %52, %51 : vector<8x128xf32>
      %54 = arith.divf %52, %53 : vector<8x128xf32>
      %55 = arith.mulf %46, %29 : vector<8x128xf32>
      %56 = arith.mulf %40, %48 : vector<8x128xf32>
      %57 = arith.addf %55, %56 : vector<8x128xf32>
      %58 = math.tanh %57 : vector<8x128xf32>
      %59 = arith.mulf %54, %58 : vector<8x128xf32>
      %60 = arith.truncf %59 : vector<8x128xf32> to vector<8x128xbf16>
      %c0_37 = arith.constant 0 : index
      %c0_38 = arith.constant 0 : index
      %61 = vector.load %arg16[%c0_37, %c0_38] : memref<8x256xbf16, #tpu.memory_space<vmem>>, vector<8x128xbf16>
      tpu.vector_store %arg16[%c0_37, %c0_38], %60 {strides = array<i32>} : memref<8x256xbf16, #tpu.memory_space<vmem>>, vector<8x128xbf16>,
      %c1 = arith.constant 1 : index
      %c0_39 = arith.constant 0 : index
      %c0_40 = arith.constant 0 : index
      %62 = vector.load %arg1[%c1, %c0_39, %c0_40] : memref<2x8x128xf32, #tpu.memory_space<vmem>>, vector<1x8x128xf32>
      %63 = vector.shape_cast %62 : vector<1x8x128xf32> to vector<8x128xf32>
      %64 = arith.truncf %63 : vector<8x128xf32> to vector<8x128xbf16>
      %c0_41 = arith.constant 0 : index
      %c128_42 = arith.constant 128 : index
      %65 = vector.load %arg16[%c0_41, %c128_42] : memref<8x256xbf16, #tpu.memory_space<vmem>>, vector<8x128xbf16>
      tpu.vector_store %arg16[%c0_41, %c128_42], %64 {strides = array<i32>} : memref<8x256xbf16, #tpu.memory_space<vmem>>, vector<8x128xbf16>,
      %c0_43 = arith.constant 0 : index
      %c0_44 = arith.constant 0 : index
      %66 = vector.load %arg16[%c0_43, %c0_44] : memref<8x256xbf16, #tpu.memory_space<vmem>>, vector<8x256xbf16>
      %c1_45 = arith.constant 1 : index
      %c0_46 = arith.constant 0 : index
      %c0_47 = arith.constant 0 : index
      %67 = vector.load %arg2[%c1_45, %c0_46, %c0_47] : memref<2x8x128xf32, #tpu.memory_space<vmem>>, vector<1x8x128xf32>
      %68 = vector.shape_cast %67 : vector<1x8x128xf32> to vector<8x128xf32>
      %c0_48 = arith.constant 0 : index
      %c0_49 = arith.constant 0 : index
      %69 = vector.load %arg6[%c0_48, %c0_49] : memref<256x512xbf16, #tpu.memory_space<vmem>>, vector<256x512xbf16>
      %cst_50 = arith.constant dense<0.000000e+00> : vector<8x512xf32>
      %70 = tpu.matmul %66, %69, %cst_50 {dimension_numbers = #tpu.dot_dimension_numbers<[1], [0], [0], [1], [0, 0, 1, 1], [], []>} : vector<8x256xbf16>, vector<256x512xbf16>, vector<8x512xf32> -> vector<8x512xf32>
      %c0_51 = arith.constant 0 : index
      %c0_52 = arith.constant 0 : index
      %71 = vector.load %arg7[%c0_51, %c0_52] : memref<1x512xf32, #tpu.memory_space<vmem>>, vector<1x512xf32>
      %72 = vector.broadcast %71 : vector<1x512xf32> to vector<8x512xf32>
      %73 = arith.addf %70, %72 : vector<8x512xf32>
      %74 = vector.extract_strided_slice %73 {offsets = [0, 0], sizes = [8, 128], strides = [1, 1]} : vector<8x512xf32> to vector<8x128xf32>
      %75 = arith.negf %74 : vector<8x128xf32>
      %76 = math.exp %75 : vector<8x128xf32>
      %cst_53 = arith.constant 1.000000e+00 : f32
      %77 = vector.broadcast %cst_53 : f32 to vector<8x128xf32>
      %78 = arith.addf %77, %76 : vector<8x128xf32>
      %79 = arith.divf %77, %78 : vector<8x128xf32>
      %80 = vector.extract_strided_slice %73 {offsets = [0, 128], sizes = [8, 128], strides = [1, 1]} : vector<8x512xf32> to vector<8x128xf32>
      %81 = arith.negf %80 : vector<8x128xf32>
      %82 = math.exp %81 : vector<8x128xf32>
      %cst_54 = arith.constant 1.000000e+00 : f32
      %83 = vector.broadcast %cst_54 : f32 to vector<8x128xf32>
      %84 = arith.addf %83, %82 : vector<8x128xf32>
      %85 = arith.divf %83, %84 : vector<8x128xf32>
      %86 = vector.extract_strided_slice %73 {offsets = [0, 256], sizes = [8, 128], strides = [1, 1]} : vector<8x512xf32> to vector<8x128xf32>
      %87 = math.tanh %86 : vector<8x128xf32>
      %88 = vector.extract_strided_slice %73 {offsets = [0, 384], sizes = [8, 128], strides = [1, 1]} : vector<8x512xf32> to vector<8x128xf32>
      %89 = arith.negf %88 : vector<8x128xf32>
      %90 = math.exp %89 : vector<8x128xf32>
      %cst_55 = arith.constant 1.000000e+00 : f32
      %91 = vector.broadcast %cst_55 : f32 to vector<8x128xf32>
      %92 = arith.addf %91, %90 : vector<8x128xf32>
      %93 = arith.divf %91, %92 : vector<8x128xf32>
      %94 = arith.mulf %85, %68 : vector<8x128xf32>
      %95 = arith.mulf %79, %87 : vector<8x128xf32>
      %96 = arith.addf %94, %95 : vector<8x128xf32>
      %97 = math.tanh %96 : vector<8x128xf32>
      %98 = arith.mulf %93, %97 : vector<8x128xf32>
      %c0_56 = arith.constant 0 : index
      %c0_57 = arith.constant 0 : index
      %c0_58 = arith.constant 0 : index
      %99 = vector.load %arg12[%c0_56, %c0_57, %c0_58] : memref<2x8x128xf32, #tpu.memory_space<vmem>>, vector<1x8x128xf32>
      %100 = vector.shape_cast %99 : vector<1x8x128xf32> to vector<8x128xf32>
      %101 = vector.shape_cast %59 : vector<8x128xf32> to vector<1x8x128xf32>
      tpu.vector_store %arg12[%c0_56, %c0_57, %c0_58], %101 {strides = array<i32>} : memref<2x8x128xf32, #tpu.memory_space<vmem>>, vector<1x8x128xf32>,
      %c1_59 = arith.constant 1 : index
      %c0_60 = arith.constant 0 : index
      %c0_61 = arith.constant 0 : index
      %102 = vector.load %arg12[%c1_59, %c0_60, %c0_61] : memref<2x8x128xf32, #tpu.memory_space<vmem>>, vector<1x8x128xf32>
      %103 = vector.shape_cast %102 : vector<1x8x128xf32> to vector<8x128xf32>
      %104 = vector.shape_cast %98 : vector<8x128xf32> to vector<1x8x128xf32>
      tpu.vector_store %arg12[%c1_59, %c0_60, %c0_61], %104 {strides = array<i32>} : memref<2x8x128xf32, #tpu.memory_space<vmem>>, vector<1x8x128xf32>,
      %c0_62 = arith.constant 0 : index
      %c0_63 = arith.constant 0 : index
      %c0_64 = arith.constant 0 : index
      %105 = vector.load %arg13[%c0_62, %c0_63, %c0_64] : memref<2x8x128xf32, #tpu.memory_space<vmem>>, vector<1x8x128xf32>
      %106 = vector.shape_cast %105 : vector<1x8x128xf32> to vector<8x128xf32>
      %107 = vector.shape_cast %57 : vector<8x128xf32> to vector<1x8x128xf32>
      tpu.vector_store %arg13[%c0_62, %c0_63, %c0_64], %107 {strides = array<i32>} : memref<2x8x128xf32, #tpu.memory_space<vmem>>, vector<1x8x128xf32>,
      %c1_65 = arith.constant 1 : index
      %c0_66 = arith.constant 0 : index
      %c0_67 = arith.constant 0 : index
      %108 = vector.load %arg13[%c1_65, %c0_66, %c0_67] : memref<2x8x128xf32, #tpu.memory_space<vmem>>, vector<1x8x128xf32>
      %109 = vector.shape_cast %108 : vector<1x8x128xf32> to vector<8x128xf32>
      %110 = vector.shape_cast %96 : vector<8x128xf32> to vector<1x8x128xf32>
      tpu.vector_store %arg13[%c1_65, %c0_66, %c0_67], %110 {strides = array<i32>} : memref<2x8x128xf32, #tpu.memory_space<vmem>>, vector<1x8x128xf32>,
      %111 = arith.truncf %98 : vector<8x128xf32> to vector<8x128xbf16>
      %c0_68 = arith.constant 0 : index
      %c0_69 = arith.constant 0 : index
      %112 = vector.load %arg17[%c0_68, %c0_69] : memref<8x128xbf16, #tpu.memory_space<vmem>>, vector<8x128xbf16>
      tpu.vector_store %arg17[%c0_68, %c0_69], %111 {strides = array<i32>} : memref<8x128xbf16, #tpu.memory_space<vmem>>, vector<8x128xbf16>,
      %cst_70 = arith.constant 0xFF800000 : f32
      %113 = vector.broadcast %cst_70 : f32 to vector<8x1xf32>
      %c0_71 = arith.constant 0 : index
      %c0_72 = arith.constant 0 : index
      %114 = vector.load %arg14[%c0_71, %c0_72] : memref<8x1xf32, #tpu.memory_space<vmem>>, vector<8x1xf32>
      tpu.vector_store %arg14[%c0_71, %c0_72], %113 {strides = array<i32>} : memref<8x1xf32, #tpu.memory_space<vmem>>, vector<8x1xf32>,
    } else {
    }
    %c0 = arith.constant 0 : index
    %c0_1 = arith.constant 0 : index
    %c0_2 = arith.constant 0 : index
    %3 = vector.load %arg8[%c0, %c0_1, %c0_2] : memref<1x128x128xi8, #tpu.memory_space<vmem>>, vector<1x128x128xi8>
    %4 = vector.shape_cast %3 : vector<1x128x128xi8> to vector<128x128xi8>
    %5 = arith.sitofp %4 : vector<128x128xi8> to vector<128x128xbf16>
    %c0_3 = arith.constant 0 : index
    %c0_4 = arith.constant 0 : index
    %6 = vector.load %arg17[%c0_3, %c0_4] : memref<8x128xbf16, #tpu.memory_space<vmem>>, vector<8x128xbf16>
    %cst = arith.constant dense<0.000000e+00> : vector<8x128xf32>
    %7 = tpu.matmul %6, %5, %cst {dimension_numbers = #tpu.dot_dimension_numbers<[1], [0], [0], [1], [0, 0, 1, 1], [], []>} : vector<8x128xbf16>, vector<128x128xbf16>, vector<8x128xf32> -> vector<8x128xf32>
    %c0_5 = arith.constant 0 : index
    %c0_6 = arith.constant 0 : index
    %8 = vector.load %arg9[%c0_5, %c0_6] : memref<1x128xf32, #tpu.memory_space<vmem>>, vector<1x128xf32>
    %9 = vector.broadcast %8 : vector<1x128xf32> to vector<8x128xf32>
    %10 = arith.mulf %7, %9 : vector<8x128xf32>
    %c0_7 = arith.constant 0 : index
    %c0_8 = arith.constant 0 : index
    %11 = vector.load %arg10[%c0_7, %c0_8] : memref<1x128xf32, #tpu.memory_space<vmem>>, vector<1x128xf32>
    %12 = vector.broadcast %11 : vector<1x128xf32> to vector<8x128xf32>
    %13 = arith.addf %10, %12 : vector<8x128xf32>
    %14 = arith.truncf %13 : vector<8x128xf32> to vector<8x128xbf16>
    %c0_9 = arith.constant 0 : index
    %c0_10 = arith.constant 0 : index
    %15 = vector.load %arg11[%c0_9, %c0_10] : memref<8x128xbf16, #tpu.memory_space<vmem>>, vector<8x128xbf16>
    tpu.vector_store %arg11[%c0_9, %c0_10], %14 {strides = array<i32>} : memref<8x128xbf16, #tpu.memory_space<vmem>>, vector<8x128xbf16>,
    %c0_11 = arith.constant 0 : index
    %c0_12 = arith.constant 0 : index
    %16 = vector.load %arg14[%c0_11, %c0_12] : memref<8x1xf32, #tpu.memory_space<vmem>>, vector<8x1xf32>
    %cst_13 = arith.constant dense<0xFF800000> : vector<8xf32>
    %17 = vector.multi_reduction <maximumf>, %13, %cst_13 [1] : vector<8x128xf32> to vector<8xf32>
    %18 = vector.shape_cast %17 : vector<8xf32> to vector<8x1xf32>
    %19 = arith.maximumf %16, %18 : vector<8x1xf32>
    %c0_14 = arith.constant 0 : index
    %c0_15 = arith.constant 0 : index
    %20 = vector.load %arg14[%c0_14, %c0_15] : memref<8x1xf32, #tpu.memory_space<vmem>>, vector<8x1xf32>
    tpu.vector_store %arg14[%c0_14, %c0_15], %19 {strides = array<i32>} : memref<8x1xf32, #tpu.memory_space<vmem>>, vector<8x1xf32>,
    return
  }
  func.func @transform_0(%arg0: i32) -> (i32, i32, i32) {
    %c0_i32 = arith.constant 0 : i32
    %c0_i32_0 = arith.constant 0 : i32
    %c0_i32_1 = arith.constant 0 : i32
    %c0_i32_2 = arith.constant 0 : i32
    return %c0_i32, %c0_i32_0, %c0_i32_1 : i32, i32, i32
  }
  func.func @transform_1(%arg0: i32) -> (i32, i32, i32) {
    %c0_i32 = arith.constant 0 : i32
    %c0_i32_0 = arith.constant 0 : i32
    %c0_i32_1 = arith.constant 0 : i32
    %c0_i32_2 = arith.constant 0 : i32
    return %c0_i32, %c0_i32_0, %c0_i32_1 : i32, i32, i32
  }
  func.func @transform_2(%arg0: i32) -> (i32, i32) {
    %c0_i32 = arith.constant 0 : i32
    %c0_i32_0 = arith.constant 0 : i32
    %c0_i32_1 = arith.constant 0 : i32
    return %c0_i32, %c0_i32_0 : i32, i32
  }
  func.func @transform_3(%arg0: i32) -> (i32, i32) {
    %c0_i32 = arith.constant 0 : i32
    %c0_i32_0 = arith.constant 0 : i32
    %c0_i32_1 = arith.constant 0 : i32
    return %c0_i32, %c0_i32_0 : i32, i32
  }
  func.func @transform_4(%arg0: i32) -> (i32, i32) {
    %c0_i32 = arith.constant 0 : i32
    %c0_i32_0 = arith.constant 0 : i32
    %c0_i32_1 = arith.constant 0 : i32
    return %c0_i32, %c0_i32_0 : i32, i32
  }
  func.func @transform_5(%arg0: i32) -> (i32, i32) {
    %c0_i32 = arith.constant 0 : i32
    %c0_i32_0 = arith.constant 0 : i32
    %c0_i32_1 = arith.constant 0 : i32
    return %c0_i32, %c0_i32_0 : i32, i32
  }
  func.func @transform_6(%arg0: i32) -> (i32, i32) {
    %c0_i32 = arith.constant 0 : i32
    %c0_i32_0 = arith.constant 0 : i32
    %c0_i32_1 = arith.constant 0 : i32
    return %c0_i32, %c0_i32_0 : i32, i32
  }
  func.func @transform_7(%arg0: i32) -> (i32, i32, i32) {
    %c0_i32 = arith.constant 0 : i32
    %c0_i32_0 = arith.constant 0 : i32
    %c0_i32_1 = arith.constant 0 : i32
    return %arg0, %c0_i32, %c0_i32_0 : i32, i32, i32
  }
  func.func @transform_8(%arg0: i32) -> (i32, i32) {
    %c0_i32 = arith.constant 0 : i32
    %c0_i32_0 = arith.constant 0 : i32
    return %c0_i32, %arg0 : i32, i32
  }
  func.func @transform_9(%arg0: i32) -> (i32, i32) {
    %c0_i32 = arith.constant 0 : i32
    %c0_i32_0 = arith.constant 0 : i32
    return %c0_i32, %arg0 : i32, i32
  }
  func.func @transform_10(%arg0: i32) -> (i32, i32) {
    %c0_i32 = arith.constant 0 : i32
    %c0_i32_0 = arith.constant 0 : i32
    return %c0_i32, %arg0 : i32, i32
  }
  func.func @transform_11(%arg0: i32) -> (i32, i32, i32) {
    %c0_i32 = arith.constant 0 : i32
    %c0_i32_0 = arith.constant 0 : i32
    %c0_i32_1 = arith.constant 0 : i32
    %c0_i32_2 = arith.constant 0 : i32
    return %c0_i32, %c0_i32_0, %c0_i32_1 : i32, i32, i32
  }
  func.func @transform_12(%arg0: i32) -> (i32, i32, i32) {
    %c0_i32 = arith.constant 0 : i32
    %c0_i32_0 = arith.constant 0 : i32
    %c0_i32_1 = arith.constant 0 : i32
    %c0_i32_2 = arith.constant 0 : i32
    return %c0_i32, %c0_i32_0, %c0_i32_1 : i32, i32, i32
  }
  func.func @transform_13(%arg0: i32) -> (i32, i32) {
    %c0_i32 = arith.constant 0 : i32
    %c0_i32_0 = arith.constant 0 : i32
    %c0_i32_1 = arith.constant 0 : i32
    return %c0_i32, %c0_i32_0 : i32, i32
  }
}

module attributes {stable_mosaic.version = 11 : i64} {
  func.func @decoder_step_kernel(%arg0: i32, %arg1: memref<2x8x128xf32, #tpu.memory_space<vmem>>, %arg2: memref<2x8x128xf32, #tpu.memory_space<vmem>>, %arg3: memref<8x128xbf16, #tpu.memory_space<vmem>>, %arg4: memref<256x512xbf16, #tpu.memory_space<vmem>>, %arg5: memref<1x512xf32, #tpu.memory_space<vmem>>, %arg6: memref<256x512xbf16, #tpu.memory_space<vmem>>, %arg7: memref<1x512xf32, #tpu.memory_space<vmem>>, %arg8: memref<1x128x128xi8, #tpu.memory_space<vmem>>, %arg9: memref<1x128xf32, #tpu.memory_space<vmem>>, %arg10: memref<1x128xf32, #tpu.memory_space<vmem>>, %arg11: memref<8x128xbf16, #tpu.memory_space<vmem>>, %arg12: memref<2x8x128xf32, #tpu.memory_space<vmem>>, %arg13: memref<2x8x128xf32, #tpu.memory_space<vmem>>, %arg14: memref<8x1xf32, #tpu.memory_space<vmem>>, %arg15: memref<8x256xbf16, #tpu.memory_space<vmem>>, %arg16: memref<8x256xbf16, #tpu.memory_space<vmem>>, %arg17: memref<8x128xbf16, #tpu.memory_space<vmem>>) attributes {dimension_semantics = [#tpu.dimension_semantics<arbitrary>], iteration_bounds = array<i64: 2>, scalar_prefetch = 0 : i64, scratch_operands = 3 : i64, tpu.core_type = #tpu.core_type<tc>, window_params = [{pipeline_mode = #tpu.pipeline_mode<synchronous>, transform_indices = @transform_0, window_bounds = array<i64: 2, 8, 128>}, {pipeline_mode = #tpu.pipeline_mode<synchronous>, transform_indices = @transform_1, window_bounds = array<i64: 2, 8, 128>}, {pipeline_mode = #tpu.pipeline_mode<synchronous>, transform_indices = @transform_2, window_bounds = array<i64: 8, 128>}, {pipeline_mode = #tpu.pipeline_mode<synchronous>, transform_indices = @transform_3, window_bounds = array<i64: 256, 512>}, {pipeline_mode = #tpu.pipeline_mode<synchronous>, transform_indices = @transform_4, window_bounds = array<i64: 1, 512>}, {pipeline_mode = #tpu.pipeline_mode<synchronous>, transform_indices = @transform_5, window_bounds = array<i64: 256, 512>}, {pipeline_mode = #tpu.pipeline_mode<synchronous>, transform_indices = @transform_6, window_bounds = array<i64: 1, 512>}, {transform_indices = @transform_7, window_bounds = array<i64: 1, 128, 128>}, {transform_indices = @transform_8, window_bounds = array<i64: 1, 128>}, {transform_indices = @transform_9, window_bounds = array<i64: 1, 128>}, {transform_indices = @transform_10, window_bounds = array<i64: 8, 128>}, {pipeline_mode = #tpu.pipeline_mode<synchronous>, transform_indices = @transform_11, window_bounds = array<i64: 2, 8, 128>}, {pipeline_mode = #tpu.pipeline_mode<synchronous>, transform_indices = @transform_12, window_bounds = array<i64: 2, 8, 128>}, {pipeline_mode = #tpu.pipeline_mode<synchronous>, transform_indices = @transform_13, window_bounds = array<i64: 8, 1>}]} {
    %c0_i32 = arith.constant 0 : i32
    %0 = arith.cmpi eq, %arg0, %c0_i32 : i32
    %1 = arith.extui %0 : i1 to i32
    %c0_i32_0 = arith.constant 0 : i32
    %2 = arith.cmpi ne, %1, %c0_i32_0 : i32
    scf.if %2 {
      %c0_16 = arith.constant 0 : index
      %c0_17 = arith.constant 0 : index
      %21 = vector.load %arg3[%c0_16, %c0_17] : memref<8x128xbf16, #tpu.memory_space<vmem>>, vector<8x128xbf16>
      %c0_18 = arith.constant 0 : index
      %c0_19 = arith.constant 0 : index
      %22 = vector.load %arg15[%c0_18, %c0_19] : memref<8x256xbf16, #tpu.memory_space<vmem>>, vector<8x128xbf16>
      tpu.vector_store %arg15[%c0_18, %c0_19], %21 {strides = array<i32>} : memref<8x256xbf16, #tpu.memory_space<vmem>>, vector<8x128xbf16>,
      %c0_20 = arith.constant 0 : index
      %c0_21 = arith.constant 0 : index
      %c0_22 = arith.constant 0 : index
      %23 = vector.load %arg1[%c0_20, %c0_21, %c0_22] : memref<2x8x128xf32, #tpu.memory_space<vmem>>, vector<1x8x128xf32>
      %24 = vector.shape_cast %23 : vector<1x8x128xf32> to vector<8x128xf32>
      %25 = arith.truncf %24 : vector<8x128xf32> to vector<8x128xbf16>
      %c0_23 = arith.constant 0 : index
      %c128 = arith.constant 128 : index
      %26 = vector.load %arg15[%c0_23, %c128] : memref<8x256xbf16, #tpu.memory_space<vmem>>, vector<8x128xbf16>
      tpu.vector_store %arg15[%c0_23, %c128], %25 {strides = array<i32>} : memref<8x256xbf16, #tpu.memory_space<vmem>>, vector<8x128xbf16>,
      %c0_24 = arith.constant 0 : index
      %c0_25 = arith.constant 0 : index
      %27 = vector.load %arg15[%c0_24, %c0_25] : memref<8x256xbf16, #tpu.memory_space<vmem>>, vector<8x256xbf16>
      %c0_26 = arith.constant 0 : index
      %c0_27 = arith.constant 0 : index
      %c0_28 = arith.constant 0 : index
      %28 = vector.load %arg2[%c0_26, %c0_27, %c0_28] : memref<2x8x128xf32, #tpu.memory_space<vmem>>, vector<1x8x128xf32>
      %29 = vector.shape_cast %28 : vector<1x8x128xf32> to vector<8x128xf32>
      %c0_29 = arith.constant 0 : index
      %c0_30 = arith.constant 0 : index
      %30 = vector.load %arg4[%c0_29, %c0_30] : memref<256x512xbf16, #tpu.memory_space<vmem>>, vector<256x512xbf16>
      %cst_31 = arith.constant dense<0.000000e+00> : vector<8x512xf32>
      %31 = tpu.matmul %27, %30, %cst_31 {dimension_numbers = #tpu.dot_dimension_numbers<[1], [0], [0], [1], [0, 0, 1, 1], [], []>} : vector<8x256xbf16>, vector<256x512xbf16>, vector<8x512xf32> -> vector<8x512xf32>
      %c0_32 = arith.constant 0 : index
      %c0_33 = arith.constant 0 : index
      %32 = vector.load %arg5[%c0_32, %c0_33] : memref<1x512xf32, #tpu.memory_space<vmem>>, vector<1x512xf32>
      %33 = vector.broadcast %32 : vector<1x512xf32> to vector<8x512xf32>
      %34 = arith.addf %31, %33 : vector<8x512xf32>
      %35 = vector.extract_strided_slice %34 {offsets = [0, 0], sizes = [8, 128], strides = [1, 1]} : vector<8x512xf32> to vector<8x128xf32>
      %36 = arith.negf %35 : vector<8x128xf32>
      %37 = math.exp %36 : vector<8x128xf32>
      %cst_34 = arith.constant 1.000000e+00 : f32
      %38 = vector.broadcast %cst_34 : f32 to vector<8x128xf32>
      %39 = arith.addf %38, %37 : vector<8x128xf32>
      %40 = arith.divf %38, %39 : vector<8x128xf32>
      %41 = vector.extract_strided_slice %34 {offsets = [0, 128], sizes = [8, 128], strides = [1, 1]} : vector<8x512xf32> to vector<8x128xf32>
      %42 = arith.negf %41 : vector<8x128xf32>
      %43 = math.exp %42 : vector<8x128xf32>
      %cst_35 = arith.constant 1.000000e+00 : f32
      %44 = vector.broadcast %cst_35 : f32 to vector<8x128xf32>
      %45 = arith.addf %44, %43 : vector<8x128xf32>
      %46 = arith.divf %44, %45 : vector<8x128xf32>
      %47 = vector.extract_strided_slice %34 {offsets = [0, 256], sizes = [8, 128], strides = [1, 1]} : vector<8x512xf32> to vector<8x128xf32>
      %48 = math.tanh %47 : vector<8x128xf32>
      %49 = vector.extract_strided_slice %34 {offsets = [0, 384], sizes = [8, 128], strides = [1, 1]} : vector<8x512xf32> to vector<8x128xf32>
      %50 = arith.negf %49 : vector<8x128xf32>
      %51 = math.exp %50 : vector<8x128xf32>
      %cst_36 = arith.constant 1.000000e+00 : f32
      %52 = vector.broadcast %cst_36 : f32 to vector<8x128xf32>
      %53 = arith.addf %52, %51 : vector<8x128xf32>
      %54 = arith.divf %52, %53 : vector<8x128xf32>
      %55 = arith.mulf %46, %29 : vector<8x128xf32>
      %56 = arith.mulf %40, %48 : vector<8x128xf32>
      %57 = arith.addf %55, %56 : vector<8x128xf32>
      %58 = math.tanh %57 : vector<8x128xf32>
      %59 = arith.mulf %54, %58 : vector<8x128xf32>
      %60 = arith.truncf %59 : vector<8x128xf32> to vector<8x128xbf16>
      %c0_37 = arith.constant 0 : index
      %c0_38 = arith.constant 0 : index
      %61 = vector.load %arg16[%c0_37, %c0_38] : memref<8x256xbf16, #tpu.memory_space<vmem>>, vector<8x128xbf16>
      tpu.vector_store %arg16[%c0_37, %c0_38], %60 {strides = array<i32>} : memref<8x256xbf16, #tpu.memory_space<vmem>>, vector<8x128xbf16>,
      %c1 = arith.constant 1 : index
      %c0_39 = arith.constant 0 : index
      %c0_40 = arith.constant 0 : index
      %62 = vector.load %arg1[%c1, %c0_39, %c0_40] : memref<2x8x128xf32, #tpu.memory_space<vmem>>, vector<1x8x128xf32>
      %63 = vector.shape_cast %62 : vector<1x8x128xf32> to vector<8x128xf32>
      %64 = arith.truncf %63 : vector<8x128xf32> to vector<8x128xbf16>
      %c0_41 = arith.constant 0 : index
      %c128_42 = arith.constant 128 : index
      %65 = vector.load %arg16[%c0_41, %c128_42] : memref<8x256xbf16, #tpu.memory_space<vmem>>, vector<8x128xbf16>
      tpu.vector_store %arg16[%c0_41, %c128_42], %64 {strides = array<i32>} : memref<8x256xbf16, #tpu.memory_space<vmem>>, vector<8x128xbf16>,
      %c0_43 = arith.constant 0 : index
      %c0_44 = arith.constant 0 : index
      %66 = vector.load %arg16[%c0_43, %c0_44] : memref<8x256xbf16, #tpu.memory_space<vmem>>, vector<8x256xbf16>
      %c1_45 = arith.constant 1 : index
      %c0_46 = arith.constant 0 : index
      %c0_47 = arith.constant 0 : index
      %67 = vector.load %arg2[%c1_45, %c0_46, %c0_47] : memref<2x8x128xf32, #tpu.memory_space<vmem>>, vector<1x8x128xf32>
      %68 = vector.shape_cast %67 : vector<1x8x128xf32> to vector<8x128xf32>
      %c0_48 = arith.constant 0 : index
      %c0_49 = arith.constant 0 : index
      %69 = vector.load %arg6[%c0_48, %c0_49] : memref<256x512xbf16, #tpu.memory_space<vmem>>, vector<256x512xbf16>
      %cst_50 = arith.constant dense<0.000000e+00> : vector<8x512xf32>
      %70 = tpu.matmul %66, %69, %cst_50 {dimension_numbers = #tpu.dot_dimension_numbers<[1], [0], [0], [1], [0, 0, 1, 1], [], []>} : vector<8x256xbf16>, vector<256x512xbf16>, vector<8x512xf32> -> vector<8x512xf32>
      %c0_51 = arith.constant 0 : index
      %c0_52 = arith.constant 0 : index
      %71 = vector.load %arg7[%c0_51, %c0_52] : memref<1x512xf32, #tpu.memory_space<vmem>>, vector<1x512xf32>
      %72 = vector.broadcast %71 : vector<1x512xf32> to vector<8x512xf32>
      %73 = arith.addf %70, %72 : vector<8x512xf32>
      %74 = vector.extract_strided_slice %73 {offsets = [0, 0], sizes = [8, 128], strides = [1, 1]} : vector<8x512xf32> to vector<8x128xf32>
      %75 = arith.negf %74 : vector<8x128xf32>
      %76 = math.exp %75 : vector<8x128xf32>
      %cst_53 = arith.constant 1.000000e+00 : f32
      %77 = vector.broadcast %cst_53 : f32 to vector<8x128xf32>
      %78 = arith.addf %77, %76 : vector<8x128xf32>
      %79 = arith.divf %77, %78 : vector<8x128xf32>
      %80 = vector.extract_strided_slice %73 {offsets = [0, 128], sizes = [8, 128], strides = [1, 1]} : vector<8x512xf32> to vector<8x128xf32>
      %81 = arith.negf %80 : vector<8x128xf32>
      %82 = math.exp %81 : vector<8x128xf32>
      %cst_54 = arith.constant 1.000000e+00 : f32
      %83 = vector.broadcast %cst_54 : f32 to vector<8x128xf32>
      %84 = arith.addf %83, %82 : vector<8x128xf32>
      %85 = arith.divf %83, %84 : vector<8x128xf32>
      %86 = vector.extract_strided_slice %73 {offsets = [0, 256], sizes = [8, 128], strides = [1, 1]} : vector<8x512xf32> to vector<8x128xf32>
      %87 = math.tanh %86 : vector<8x128xf32>
      %88 = vector.extract_strided_slice %73 {offsets = [0, 384], sizes = [8, 128], strides = [1, 1]} : vector<8x512xf32> to vector<8x128xf32>
      %89 = arith.negf %88 : vector<8x128xf32>
      %90 = math.exp %89 : vector<8x128xf32>
      %cst_55 = arith.constant 1.000000e+00 : f32
      %91 = vector.broadcast %cst_55 : f32 to vector<8x128xf32>
      %92 = arith.addf %91, %90 : vector<8x128xf32>
      %93 = arith.divf %91, %92 : vector<8x128xf32>
      %94 = arith.mulf %85, %68 : vector<8x128xf32>
      %95 = arith.mulf %79, %87 : vector<8x128xf32>
      %96 = arith.addf %94, %95 : vector<8x128xf32>
      %97 = math.tanh %96 : vector<8x128xf32>
      %98 = arith.mulf %93, %97 : vector<8x128xf32>
      %c0_56 = arith.constant 0 : index
      %c0_57 = arith.constant 0 : index
      %c0_58 = arith.constant 0 : index
      %99 = vector.load %arg12[%c0_56, %c0_57, %c0_58] : memref<2x8x128xf32, #tpu.memory_space<vmem>>, vector<1x8x128xf32>
      %100 = vector.shape_cast %99 : vector<1x8x128xf32> to vector<8x128xf32>
      %101 = vector.shape_cast %59 : vector<8x128xf32> to vector<1x8x128xf32>
      tpu.vector_store %arg12[%c0_56, %c0_57, %c0_58], %101 {strides = array<i32>} : memref<2x8x128xf32, #tpu.memory_space<vmem>>, vector<1x8x128xf32>,
      %c1_59 = arith.constant 1 : index
      %c0_60 = arith.constant 0 : index
      %c0_61 = arith.constant 0 : index
      %102 = vector.load %arg12[%c1_59, %c0_60, %c0_61] : memref<2x8x128xf32, #tpu.memory_space<vmem>>, vector<1x8x128xf32>
      %103 = vector.shape_cast %102 : vector<1x8x128xf32> to vector<8x128xf32>
      %104 = vector.shape_cast %98 : vector<8x128xf32> to vector<1x8x128xf32>
      tpu.vector_store %arg12[%c1_59, %c0_60, %c0_61], %104 {strides = array<i32>} : memref<2x8x128xf32, #tpu.memory_space<vmem>>, vector<1x8x128xf32>,
      %c0_62 = arith.constant 0 : index
      %c0_63 = arith.constant 0 : index
      %c0_64 = arith.constant 0 : index
      %105 = vector.load %arg13[%c0_62, %c0_63, %c0_64] : memref<2x8x128xf32, #tpu.memory_space<vmem>>, vector<1x8x128xf32>
      %106 = vector.shape_cast %105 : vector<1x8x128xf32> to vector<8x128xf32>
      %107 = vector.shape_cast %57 : vector<8x128xf32> to vector<1x8x128xf32>
      tpu.vector_store %arg13[%c0_62, %c0_63, %c0_64], %107 {strides = array<i32>} : memref<2x8x128xf32, #tpu.memory_space<vmem>>, vector<1x8x128xf32>,
      %c1_65 = arith.constant 1 : index
      %c0_66 = arith.constant 0 : index
      %c0_67 = arith.constant 0 : index
      %108 = vector.load %arg13[%c1_65, %c0_66, %c0_67] : memref<2x8x128xf32, #tpu.memory_space<vmem>>, vector<1x8x128xf32>
      %109 = vector.shape_cast %108 : vector<1x8x128xf32> to vector<8x128xf32>
      %110 = vector.shape_cast %96 : vector<8x128xf32> to vector<1x8x128xf32>
      tpu.vector_store %arg13[%c1_65, %c0_66, %c0_67], %110 {strides = array<i32>} : memref<2x8x128xf32, #tpu.memory_space<vmem>>, vector<1x8x128xf32>,
      %111 = arith.truncf %98 : vector<8x128xf32> to vector<8x128xbf16>
      %c0_68 = arith.constant 0 : index
      %c0_69 = arith.constant 0 : index
      %112 = vector.load %arg17[%c0_68, %c0_69] : memref<8x128xbf16, #tpu.memory_space<vmem>>, vector<8x128xbf16>
      tpu.vector_store %arg17[%c0_68, %c0_69], %111 {strides = array<i32>} : memref<8x128xbf16, #tpu.memory_space<vmem>>, vector<8x128xbf16>,
      %cst_70 = arith.constant 0xFF800000 : f32
      %113 = vector.broadcast %cst_70 : f32 to vector<8x1xf32>
      %c0_71 = arith.constant 0 : index
      %c0_72 = arith.constant 0 : index
      %114 = vector.load %arg14[%c0_71, %c0_72] : memref<8x1xf32, #tpu.memory_space<vmem>>, vector<8x1xf32>
      tpu.vector_store %arg14[%c0_71, %c0_72], %113 {strides = array<i32>} : memref<8x1xf32, #tpu.memory_space<vmem>>, vector<8x1xf32>,
    } else {
    }
    %c0 = arith.constant 0 : index
    %c0_1 = arith.constant 0 : index
    %c0_2 = arith.constant 0 : index
    %3 = vector.load %arg8[%c0, %c0_1, %c0_2] : memref<1x128x128xi8, #tpu.memory_space<vmem>>, vector<1x128x128xi8>
    %4 = vector.shape_cast %3 : vector<1x128x128xi8> to vector<128x128xi8>
    %5 = arith.sitofp %4 : vector<128x128xi8> to vector<128x128xbf16>
    %c0_3 = arith.constant 0 : index
    %c0_4 = arith.constant 0 : index
    %6 = vector.load %arg17[%c0_3, %c0_4] : memref<8x128xbf16, #tpu.memory_space<vmem>>, vector<8x128xbf16>
    %cst = arith.constant dense<0.000000e+00> : vector<8x128xf32>
    %7 = tpu.matmul %6, %5, %cst {dimension_numbers = #tpu.dot_dimension_numbers<[1], [0], [0], [1], [0, 0, 1, 1], [], []>} : vector<8x128xbf16>, vector<128x128xbf16>, vector<8x128xf32> -> vector<8x128xf32>
    %c0_5 = arith.constant 0 : index
    %c0_6 = arith.constant 0 : index
    %8 = vector.load %arg9[%c0_5, %c0_6] : memref<1x128xf32, #tpu.memory_space<vmem>>, vector<1x128xf32>
    %9 = vector.broadcast %8 : vector<1x128xf32> to vector<8x128xf32>
    %10 = arith.mulf %7, %9 : vector<8x128xf32>
    %c0_7 = arith.constant 0 : index
    %c0_8 = arith.constant 0 : index
    %11 = vector.load %arg10[%c0_7, %c0_8] : memref<1x128xf32, #tpu.memory_space<vmem>>, vector<1x128xf32>
    %12 = vector.broadcast %11 : vector<1x128xf32> to vector<8x128xf32>
    %13 = arith.addf %10, %12 : vector<8x128xf32>
    %14 = arith.truncf %13 : vector<8x128xf32> to vector<8x128xbf16>
    %c0_9 = arith.constant 0 : index
    %c0_10 = arith.constant 0 : index
    %15 = vector.load %arg11[%c0_9, %c0_10] : memref<8x128xbf16, #tpu.memory_space<vmem>>, vector<8x128xbf16>
    tpu.vector_store %arg11[%c0_9, %c0_10], %14 {strides = array<i32>} : memref<8x128xbf16, #tpu.memory_space<vmem>>, vector<8x128xbf16>,
    %c0_11 = arith.constant 0 : index
    %c0_12 = arith.constant 0 : index
    %16 = vector.load %arg14[%c0_11, %c0_12] : memref<8x1xf32, #tpu.memory_space<vmem>>, vector<8x1xf32>
    %cst_13 = arith.constant dense<0xFF800000> : vector<8xf32>
    %17 = vector.multi_reduction <maximumf>, %13, %cst_13 [1] : vector<8x128xf32> to vector<8xf32>
    %18 = vector.shape_cast %17 : vector<8xf32> to vector<8x1xf32>
    %19 = arith.maximumf %16, %18 : vector<8x1xf32>
    %c0_14 = arith.constant 0 : index
    %c0_15 = arith.constant 0 : index
    %20 = vector.load %arg14[%c0_14, %c0_15] : memref<8x1xf32, #tpu.memory_space<vmem>>, vector<8x1xf32>
    tpu.vector_store %arg14[%c0_14, %c0_15], %19 {strides = array<i32>} : memref<8x1xf32, #tpu.memory_space<vmem>>, vector<8x1xf32>,
    return
  }
  func.func @transform_0(%arg0: i32) -> (i32, i32, i32) {
    %c0_i32 = arith.constant 0 : i32
    %c0_i32_0 = arith.constant 0 : i32
    %c0_i32_1 = arith.constant 0 : i32
    %c0_i32_2 = arith.constant 0 : i32
    return %c0_i32, %c0_i32_0, %c0_i32_1 : i32, i32, i32
  }
  func.func @transform_1(%arg0: i32) -> (i32, i32, i32) {
    %c0_i32 = arith.constant 0 : i32
    %c0_i32_0 = arith.constant 0 : i32
    %c0_i32_1 = arith.constant 0 : i32
    %c0_i32_2 = arith.constant 0 : i32
    return %c0_i32, %c0_i32_0, %c0_i32_1 : i32, i32, i32
  }
  func.func @transform_2(%arg0: i32) -> (i32, i32) {
    %c0_i32 = arith.constant 0 : i32
    %c0_i32_0 = arith.constant 0 : i32
    %c0_i32_1 = arith.constant 0 : i32
    return %c0_i32, %c0_i32_0 : i32, i32
  }
  func.func @transform_3(%arg0: i32) -> (i32, i32) {
    %c0_i32 = arith.constant 0 : i32
    %c0_i32_0 = arith.constant 0 : i32
    %c0_i32_1 = arith.constant 0 : i32
    return %c0_i32, %c0_i32_0 : i32, i32
  }
  func.func @transform_4(%arg0: i32) -> (i32, i32) {
    %c0_i32 = arith.constant 0 : i32
    %c0_i32_0 = arith.constant 0 : i32
    %c0_i32_1 = arith.constant 0 : i32
    return %c0_i32, %c0_i32_0 : i32, i32
  }
  func.func @transform_5(%arg0: i32) -> (i32, i32) {
    %c0_i32 = arith.constant 0 : i32
    %c0_i32_0 = arith.constant 0 : i32
    %c0_i32_1 = arith.constant 0 : i32
    return %c0_i32, %c0_i32_0 : i32, i32
  }
  func.func @transform_6(%arg0: i32) -> (i32, i32) {
    %c0_i32 = arith.constant 0 : i32
    %c0_i32_0 = arith.constant 0 : i32
    %c0_i32_1 = arith.constant 0 : i32
    return %c0_i32, %c0_i32_0 : i32, i32
  }
  func.func @transform_7(%arg0: i32) -> (i32, i32, i32) {
    %c0_i32 = arith.constant 0 : i32
    %c0_i32_0 = arith.constant 0 : i32
    %c0_i32_1 = arith.constant 0 : i32
    return %arg0, %c0_i32, %c0_i32_0 : i32, i32, i32
  }
  func.func @transform_8(%arg0: i32) -> (i32, i32) {
    %c0_i32 = arith.constant 0 : i32
    %c0_i32_0 = arith.constant 0 : i32
    return %c0_i32, %arg0 : i32, i32
  }
  func.func @transform_9(%arg0: i32) -> (i32, i32) {
    %c0_i32 = arith.constant 0 : i32
    %c0_i32_0 = arith.constant 0 : i32
    return %c0_i32, %arg0 : i32, i32
  }
  func.func @transform_10(%arg0: i32) -> (i32, i32) {
    %c0_i32 = arith.constant 0 : i32
    %c0_i32_0 = arith.constant 0 : i32
    return %c0_i32, %arg0 : i32, i32
  }
  func.func @transform_11(%arg0: i32) -> (i32, i32, i32) {
    %c0_i32 = arith.constant 0 : i32
    %c0_i32_0 = arith.constant 0 : i32
    %c0_i32_1 = arith.constant 0 : i32
    %c0_i32_2 = arith.constant 0 : i32
    return %c0_i32, %c0_i32_0, %c0_i32_1 : i32, i32, i32
  }
  func.func @transform_12(%arg0: i32) -> (i32, i32, i32) {
    %c0_i32 = arith.constant 0 : i32
    %c0_i32_0 = arith.constant 0 : i32
    %c0_i32_1 = arith.constant 0 : i32
    %c0_i32_2 = arith.constant 0 : i32
    return %c0_i32, %c0_i32_0, %c0_i32_1 : i32, i32, i32
  }
  func.func @transform_13(%arg0: i32) -> (i32, i32) {
    %c0_i32 = arith.constant 0 : i32
    %c0_i32_0 = arith.constant 0 : i32
    %c0_i32_1 = arith.constant 0 : i32
    return %c0_i32, %c0_i32_0 : i32, i32
  }
}

</mosaic_0001>

<bundles_post_ra>
// kernel: step.1
= control target key start
LH: loop header
LB: loop body
LE: loop exit
PB: predicated region body
PF: predicated region fallthrough
CT: control target
= control target key end

     0   :  { %s2204_s25 = smov 0   ;;  %s2688_s0 = inlined_call_operand.vmem [shape: f32[2,8,128], index: 0, kind: input, shape index: {}, may-alias: {0,11}]   ;;  %s2689_s1 = inlined_call_operand.vmem [shape: f32[2,8,128], index: 1, kind: input, shape index: {}, may-alias: {1,12}]   ;;  %s2690_s2 = inlined_call_operand.vmem [shape: bf16[8,128], index: 2, kind: input, shape index: {}]   ;;  %s2691_s3 = inlined_call_operand.vmem [shape: bf16[256,512], index: 3, kind: input, shape index: {}]   ;;  %s2692_s4 = inlined_call_operand.vmem [shape: f32[1,512], index: 4, kind: input, shape index: {}]   ;;  %s2693_s5 = inlined_call_operand.vmem [shape: bf16[256,512], index: 5, kind: input, shape index: {}]   ;;  %s2694_s6 = inlined_call_operand.vmem [shape: f32[1,512], index: 6, kind: input, shape index: {}]   ;;  %s2695_s7 = inlined_call_operand.vmem [shape: s8[2,128,128], index: 7, kind: input, shape index: {}]   ;;  %s2696_s8 = inlined_call_operand.vmem [shape: f32[1,256], index: 8, kind: input, shape index: {}]   ;;  %s2697_s9 = inlined_call_operand.vmem [shape: f32[1,256], index: 9, kind: input, shape index: {}]   ;;  %s2698_s10 = inlined_call_operand.vmem [shape: bf16[8,256], index: 10, kind: output, shape index: {0}]   ;;  %s2699_s11 = inlined_call_operand.vmem [shape: f32[2,8,128], index: 11, kind: output, shape index: {1}, may-alias: {0,11}]   ;;  %s2700_s12 = inlined_call_operand.vmem [shape: f32[2,8,128], index: 12, kind: output, shape index: {2}, may-alias: {1,12}]   ;;  %s2701_s13 = inlined_call_operand.vmem [shape: f32[8,1], index: 13, kind: output, shape index: {3}]  }
   0x1 LB: > { %2703 = sst [smem:[#allocation5_spill]] %s2129_s25  ;;  %s1694_s26 = sadd.s32 4294967295, %s2129_s25   ;;  %s2129_s25 = sphi %s2204_s25, %s24_s25  }
   0x2   : > { %p1698_p0 = scmp.ge.s32.totalorder %s2129_s25, 1  ;;  %p395_p1 = scmp.lt.s32.totalorder %s2129_s25, 3 }
   0x4   : > { %p396_p2 = pnand %p1698_p0, %p395_p1 }
   0x5   : > { %p444_p3 = scmp.lt.s32.totalorder (!%p396_p2), %s1694_s26, 1  ;;  %p1702_p4 = scmp.ne.s32.totalorder (!%p396_p2), %s1694_s26, 0 }
   0x6   : > { %399 = sbr.rel (%p396_p2) target bundleno = 995 (0x3e3), region = 60 }
   0xd   : > { %s2212_s27 = scalar_select %p444_p3, %s1694_s26, 1 }
   0xe   : > { %463 = sbr.rel (%p1702_p4) target bundleno = 600 (0x258), region = 64  ;;  %v1897_v0 = vld [vmem:[%s2691_s3 + $0x4] ss:$16 sps:$4 sm:$0xff] (!%p1702_p4)   ;;  %v1899_v1 = vld [vmem:[%s2691_s3] ss:$16 sps:$4 sm:$0xff] (!%p1702_p4)   ;;  %vm1526_vm0 = vcmask (!%p1702_p4), 7168  }
   0xf   : > { %s1849_s28 = sshll.u32 %s2212_s27, 5  ;;  %s451_s14 = scalar_lea.vmem %s2696_s8, %s2212_s27  ;;  %884 = vmatprep.subr.bf16.mxu0 (!%p1702_p4), %v1897_v0  ;;  %v1900_v2 = vld [vmem:[%s2691_s3 + $0x24] ss:$16 sps:$4 sm:$0xff] (!%p1702_p4)   ;;  %v1902_v3 = vld [vmem:[%s2691_s3 + $0x20] ss:$16 sps:$4 sm:$0xff] (!%p1702_p4)  }
  0x10   : > { %s2222_s17 = scalar_lea.vmem %s2695_s7, %s1849_s28  ;;  %s454_s20 = scalar_lea.vmem %s2697_s9, %s2212_s27  ;;  %885 = vmatpush1.bf16.msra.mxu0 (!%p1702_p4), %v1899_v1  ;;  %v1903_v4 = vld [vmem:[%s2691_s3 + $0x44] ss:$16 sps:$4 sm:$0xff] (!%p1702_p4)   ;;  %v1908_v5 = vld [vmem:[%s2691_s3 + $0xc] ss:$16 sps:$4 sm:$0xff] (!%p1702_p4)   ;;  %v1911_v6 = vld [vmem:[%s2691_s3 + $0x8] ss:$16 sps:$4 sm:$0xff] (!%p1702_p4)  }
  0x11   : > { %s1701_s21 = sshll.u32 %s2212_s27, 2  ;;  %886 = vmatprep.subr.bf16.mxu0 (!%p1702_p4), %v1900_v2  ;;  %v1905_v7 = vld [vmem:[%s2691_s3 + $0x40] ss:$16 sps:$4 sm:$0xff] (!%p1702_p4)   ;;  %925 = vmatprep.subr.bf16.mxu1 (!%p1702_p4), %v1908_v5  ;;  %v1906_v8 = vld [vmem:[%s2691_s3 + $0x64] ss:$16 sps:$4 sm:$0xff] (!%p1702_p4)  }
  0x12   : > { %s2232_s24 = scalar_lea.vmem %s2698_s10, %s1701_s21  ;;  %926 = vmatpush1.bf16.msra.mxu1 (!%p1702_p4), %v1911_v6  ;;  %v1914_v9 = vld [vmem:[%s2691_s3 + $0x2c] ss:$16 sps:$4 sm:$0xff] (!%p1702_p4)   ;;  %v1917_v10 = vld [vmem:[%s2691_s3 + $0x28] ss:$16 sps:$4 sm:$0xff] (!%p1702_p4)   ;;  %v1910_v11 = vld [vmem:[%s2691_s3 + $0x60] ss:$16 sps:$4 sm:$0xff] (!%p1702_p4)  }
  0x13   : > { %927 = vmatprep.subr.bf16.mxu1 (!%p1702_p4), %v1914_v9  ;;  %v1912_v12 = vld [vmem:[%s2691_s3 + $0x84] ss:$16 sps:$4 sm:$0xff] (!%p1702_p4)   ;;  %v1920_v13 = vld [vmem:[%s2691_s3 + $0x4c] ss:$16 sps:$4 sm:$0xff] (!%p1702_p4)   ;;  %v1923_v14 = vld [vmem:[%s2691_s3 + $0x48] ss:$16 sps:$4 sm:$0xff] (!%p1702_p4)  }
  0x14   : > { %887 = vmatpush1.bf16.msra.mxu0 (!%p1702_p4), %v1902_v3  ;;  %v1926_v15 = vld [vmem:[%s2691_s3 + $0x6c] ss:$16 sps:$4 sm:$0xff] (!%p1702_p4)   ;;  %v1916_v16 = vld [vmem:[%s2691_s3 + $0x80] ss:$16 sps:$4 sm:$0xff] (!%p1702_p4)   ;;  %v1918_v17 = vld [vmem:[%s2691_s3 + $0xa4] ss:$16 sps:$4 sm:$0xff] (!%p1702_p4)  }
  0x15   : > { %888 = vmatprep.subr.bf16.mxu0 %v1903_v4  ;;  %v1929_v18 = vld [vmem:[%s2691_s3 + $0x68] ss:$16 sps:$4 sm:$0xff]   ;;  %v1932_v19 = vld [vmem:[%s2691_s3 + $0x8c] ss:$16 sps:$4 sm:$0xff]   ;;  %v1922_v20 = vld [vmem:[%s2691_s3 + $0xa0] ss:$16 sps:$4 sm:$0xff]  }
  0x16   : > { %928 = vmatpush1.bf16.msra.mxu1 %v1917_v10  ;;  %v1924_v21 = vld [vmem:[%s2691_s3 + $0xc4] ss:$16 sps:$4 sm:$0xff]   ;;  %v1935_v22 = vld [vmem:[%s2691_s3 + $0x88] ss:$16 sps:$4 sm:$0xff]   ;;  %v1938_v23 = vld [vmem:[%s2691_s3 + $0xac] ss:$16 sps:$4 sm:$0xff]  }
  0x17   : > { %929 = vmatprep.subr.bf16.mxu1 %v1920_v13  ;;  %v1928_v24 = vld [vmem:[%s2691_s3 + $0xc0] ss:$16 sps:$4 sm:$0xff]   ;;  %v1930_v25 = vld [vmem:[%s2691_s3 + $0xe4] ss:$16 sps:$4 sm:$0xff]   ;;  %v1941_v26 = vld [vmem:[%s2691_s3 + $0xa8] ss:$16 sps:$4 sm:$0xff]  }
  0x18   : > { %889 = vmatpush1.bf16.msra.mxu0 %v1905_v7  ;;  %v1944_v27 = vld [vmem:[%s2691_s3 + $0xcc] ss:$16 sps:$4 sm:$0xff]   ;;  %v1934_v28 = vld [vmem:[%s2691_s3 + $0xe0] ss:$16 sps:$4 sm:$0xff]   ;;  %v1936_v29 = vld [vmem:[%s2691_s3 + $0x104] ss:$16 sps:$4 sm:$0xff]  }
  0x19   : > { %890 = vmatprep.subr.bf16.mxu0 %v1906_v8  ;;  %v1947_v30 = vld [vmem:[%s2691_s3 + $0xc8] ss:$16 sps:$4 sm:$0xff]   ;;  %v1950_v31 = vld [vmem:[%s2691_s3 + $0xec] ss:$16 sps:$4 sm:$0xff]   ;;  %v1940_v32 = vld [vmem:[%s2691_s3 + $0x100] ss:$16 sps:$4 sm:$0xff]  }
  0x1a   : > { %930 = vmatpush1.bf16.msra.mxu1 %v1923_v14  ;;  %v1942_v33 = vld [vmem:[%s2691_s3 + $0x124] ss:$16 sps:$4 sm:$0xff]   ;;  %v1953_v34 = vld [vmem:[%s2691_s3 + $0xe8] ss:$16 sps:$4 sm:$0xff]   ;;  %v1956_v35 = vld [vmem:[%s2691_s3 + $0x10c] ss:$16 sps:$4 sm:$0xff]  }
  0x1b   : > { %931 = vmatprep.subr.bf16.mxu1 %v1926_v15  ;;  %v1946_v36 = vld [vmem:[%s2691_s3 + $0x120] ss:$16 sps:$4 sm:$0xff]   ;;  %v1948_v37 = vld [vmem:[%s2691_s3 + $0x144] ss:$16 sps:$4 sm:$0xff]   ;;  %v1959_v38 = vld [vmem:[%s2691_s3 + $0x108] ss:$16 sps:$4 sm:$0xff]  }
  0x1c   : > { %891 = vmatpush1.bf16.msra.mxu0 %v1910_v11  ;;  %v1962_v39 = vld [vmem:[%s2691_s3 + $0x12c] ss:$16 sps:$4 sm:$0xff]   ;;  %v1952_v40 = vld [vmem:[%s2691_s3 + $0x140] ss:$16 sps:$4 sm:$0xff]   ;;  %v1954_v43 = vld [vmem:[%s2691_s3 + $0x164] ss:$16 sps:$4 sm:$0xff]  }
  0x1d   : > { %892 = vmatprep.subr.bf16.mxu0 %v1912_v12  ;;  %v464_v41 = vld [vmem:[%s2690_s2] sm:$0xf]  ;;  %v1965_v44 = vld [vmem:[%s2691_s3 + $0x128] ss:$16 sps:$4 sm:$0xff]   ;;  %v1968_v46 = vld [vmem:[%s2691_s3 + $0x14c] ss:$16 sps:$4 sm:$0xff]  }
  0x1e   : > { %932 = vmatpush1.bf16.msra.mxu1 %v1929_v18  ;;  %465 = vst [vmem:[#allocation2] sm:$0xf] %v464_v41  ;;  %v466_v42 = vld [vmem:[%s2688_s0] sm:$0xff]  ;;  %v1971_v49 = vld [vmem:[%s2691_s3 + $0x148] ss:$16 sps:$4 sm:$0xff]  }
  0x1f   : > { %933 = vmatprep.subr.bf16.mxu1 %v1932_v19  ;;  %v467_v45 = vpack.c.bf16 %v466_v42, %v466_v42  ;;  %v1958_v47 = vld [vmem:[%s2691_s3 + $0x160] ss:$16 sps:$4 sm:$0xff]   ;;  %v1960_v48 = vld [vmem:[%s2691_s3 + $0x184] ss:$16 sps:$4 sm:$0xff]   ;;  %v1974_v50 = vld [vmem:[%s2691_s3 + $0x16c] ss:$16 sps:$4 sm:$0xff]  }
  0x20   : > { %893 = vmatpush1.bf16.msra.mxu0 %v1916_v16  ;;  %v1964_v51 = vld [vmem:[%s2691_s3 + $0x180] ss:$16 sps:$4 sm:$0xff]   ;;  %v1966_v52 = vld [vmem:[%s2691_s3 + $0x1a4] ss:$16 sps:$4 sm:$0xff]   ;;  %v1977_v53 = vld [vmem:[%s2691_s3 + $0x168] ss:$16 sps:$4 sm:$0xff]  }
  0x21   : > { %894 = vmatprep.subr.bf16.mxu0 %v1918_v17  ;;  %468 = vst [vmem:[#allocation2 + $0x4] sm:$0xf] %v467_v45  ;;  %v1980_v54 = vld [vmem:[%s2691_s3 + $0x18c] ss:$16 sps:$4 sm:$0xff]   ;;  %v1970_v57 = vld [vmem:[%s2691_s3 + $0x1a0] ss:$16 sps:$4 sm:$0xff]  }
  0x22   : > { %934 = vmatpush1.bf16.msra.mxu1 %v1935_v22  ;;  %v1972_v58 = vld [vmem:[%s2691_s3 + $0x1c4] ss:$16 sps:$4 sm:$0xff]   ;;  %v1983_v59 = vld [vmem:[%s2691_s3 + $0x188] ss:$16 sps:$4 sm:$0xff]   ;;  %v1976_v60 = vld [vmem:[%s2691_s3 + $0x1c0] ss:$16 sps:$4 sm:$0xff]  }
  0x23   : > { %935 = vmatprep.subr.bf16.mxu1 %v1938_v23  ;;  %v1986_v61 = vld [vmem:[%s2691_s3 + $0x1ac] ss:$16 sps:$4 sm:$0xff]   ;;  %v1978_v62 = vld [vmem:[%s2691_s3 + $0x1e4] ss:$16 sps:$4 sm:$0xff]   ;;  %v1988_v63 = vld [vmem:[%s2691_s3 + $0x1a8] ss:$16 sps:$4 sm:$0xff]  }
  0x24   : > { %895 = vmatpush1.bf16.msra.mxu0 %v1922_v20  ;;  %v1989_v0 = vld [vmem:[%s2691_s3 + $0x1cc] ss:$16 sps:$4 sm:$0xff]   ;;  %v1982_v1 = vld [vmem:[%s2691_s3 + $0x1e0] ss:$16 sps:$4 sm:$0xff]   ;;  %v1991_v2 = vld [vmem:[%s2691_s3 + $0x1c8] ss:$16 sps:$4 sm:$0xff]  }
  0x25   : > { %896 = vmatprep.subr.bf16.mxu0 %v1924_v21  ;;  %v1997_v3 = vld [vmem:[%s2693_s5 + $0x4] ss:$16 sps:$4 sm:$0xff]   ;;  %v1992_v4 = vld [vmem:[%s2691_s3 + $0x1ec] ss:$16 sps:$4 sm:$0xff]   ;;  %v1995_v5 = vld [vmem:[%s2693_s5] ss:$16 sps:$4 sm:$0xff]  }
  0x26   : > { %936 = vmatpush1.bf16.msra.mxu1 %v1941_v26  ;;  %v1994_v7 = vld [vmem:[%s2691_s3 + $0x1e8] ss:$16 sps:$4 sm:$0xff]   ;;  %v2003_v8 = vld [vmem:[%s2693_s5 + $0x24] ss:$16 sps:$4 sm:$0xff]   ;;  %v2000_v9 = vld [vmem:[%s2693_s5 + $0xc] ss:$16 sps:$4 sm:$0xff]  }
  0x27   : > { %937 = vmatprep.subr.bf16.mxu1 %v1944_v27  ;;  %v2001_v10 = vld [vmem:[%s2693_s5 + $0x20] ss:$16 sps:$4 sm:$0xff]   ;;  %v1998_v11 = vld [vmem:[%s2693_s5 + $0x8] ss:$16 sps:$4 sm:$0xff]   ;;  %v2009_v12 = vld [vmem:[%s2693_s5 + $0x44] ss:$16 sps:$4 sm:$0xff]  }
  0x28   : > { %897 = vmatpush1.bf16.msra.mxu0 %v1928_v24  ;;  %v469_v55 = vld [vmem:[#allocation2] sm:$0xff]  ;;  %v2006_v13 = vld [vmem:[%s2693_s5 + $0x2c] ss:$16 sps:$4 sm:$0xff]   ;;  %v2004_v15 = vld [vmem:[%s2693_s5 + $0x28] ss:$16 sps:$4 sm:$0xff]  }
  0x29   : > { %898 = vmatprep.subr.bf16.mxu0 %v1930_v25  ;;  %v1704_v56 = vcombine.high %v469_v55, %v469_v55  ;;  %v1703_v6 = vcombine.low %v469_v55, %v469_v55  ;;  %v2007_v14 = vld [vmem:[%s2693_s5 + $0x40] ss:$16 sps:$4 sm:$0xff]   ;;  %v2015_v16 = vld [vmem:[%s2693_s5 + $0x64] ss:$16 sps:$4 sm:$0xff]   ;;  %v2012_v17 = vld [vmem:[%s2693_s5 + $0x4c] ss:$16 sps:$4 sm:$0xff]  }
  0x2a   : > { %938 = vmatpush1.bf16.msra.mxu1 %v1947_v30  ;;  %v2013_v18 = vld [vmem:[%s2693_s5 + $0x60] ss:$16 sps:$4 sm:$0xff]   ;;  %v2010_v19 = vld [vmem:[%s2693_s5 + $0x48] ss:$16 sps:$4 sm:$0xff]   ;;  %v2018_v20 = vld [vmem:[%s2693_s5 + $0x6c] ss:$16 sps:$4 sm:$0xff]  }
  0x2b   : > { %939 = vmatprep.subr.bf16.mxu1 %v1950_v31  ;;  %916 = vmatprep.mubr.bf16.mxu0 %v1704_v56  ;;  %v2016_v21 = vld [vmem:[%s2693_s5 + $0x68] ss:$16 sps:$4 sm:$0xff]   ;;  %v2021_v22 = vld [vmem:[%s2693_s5 + $0x84] ss:$16 sps:$4 sm:$0xff]   ;;  %v2024_v23 = vld [vmem:[%s2693_s5 + $0x8c] ss:$16 sps:$4 sm:$0xff]  }
  0x2c   : > { %899 = vmatpush1.bf16.msra.mxu0 %v1934_v28  ;;  %957 = vmatprep.mubr.bf16.mxu1 %v1704_v56  ;;  %v2019_v24 = vld [vmem:[%s2693_s5 + $0x80] ss:$16 sps:$4 sm:$0xff]   ;;  %v2022_v25 = vld [vmem:[%s2693_s5 + $0x88] ss:$16 sps:$4 sm:$0xff]   ;;  %v2027_v26 = vld [vmem:[%s2693_s5 + $0xa4] ss:$16 sps:$4 sm:$0xff]  }
  0x2d   : > { %900 = vmatprep.subr.bf16.mxu0 %v1936_v29  ;;  %v2030_v27 = vld [vmem:[%s2693_s5 + $0xac] ss:$16 sps:$4 sm:$0xff]   ;;  %v2025_v28 = vld [vmem:[%s2693_s5 + $0xa0] ss:$16 sps:$4 sm:$0xff]   ;;  %v2028_v29 = vld [vmem:[%s2693_s5 + $0xa8] ss:$16 sps:$4 sm:$0xff]  }
  0x2e   : > { %940 = vmatpush1.bf16.msra.mxu1 %v1953_v34  ;;  %v2033_v30 = vld [vmem:[%s2693_s5 + $0xc4] ss:$16 sps:$4 sm:$0xff]   ;;  %v2036_v31 = vld [vmem:[%s2693_s5 + $0xcc] ss:$16 sps:$4 sm:$0xff]   ;;  %v2046_v41 = vld [vmem:[%s2693_s5 + $0x108] ss:$16 sps:$4 sm:$0xff]  }
  0x2f   : > { %941 = vmatprep.subr.bf16.mxu1 %v1956_v35  ;;  %v2039_v34 = vld [vmem:[%s2693_s5 + $0xe4] ss:$16 sps:$4 sm:$0xff]   ;;  %v2042_v35 = vld [vmem:[%s2693_s5 + $0xec] ss:$16 sps:$4 sm:$0xff]   ;;  %v2052_v45 = vld [vmem:[%s2693_s5 + $0x128] ss:$16 sps:$4 sm:$0xff]  }
  0x30   : > { %901 = vmatpush1.bf16.msra.mxu0 %v1940_v32  ;;  %v2031_v32 = vld [vmem:[%s2693_s5 + $0xc0] ss:$16 sps:$4 sm:$0xff]   ;;  %v2051_v42 = vld [vmem:[%s2693_s5 + $0x124] ss:$16 sps:$4 sm:$0xff]   ;;  %v2072_v55 = vld [vmem:[%s2693_s5 + $0x18c] ss:$16 sps:$4 sm:$0xff]  }
  0x31   : > { %902 = vmatprep.subr.bf16.mxu0 %v1942_v33  ;;  %v2034_v33 = vld [vmem:[%s2693_s5 + $0xc8] ss:$16 sps:$4 sm:$0xff]   ;;  %v2067_v56 = vld [vmem:[%s2693_s5 + $0x180] ss:$16 sps:$4 sm:$0xff]  }
  0x32   : > { %942 = vmatpush1.bf16.msra.mxu1 %v1959_v38  ;;  %v2045_v38 = vld [vmem:[%s2693_s5 + $0x104] ss:$16 sps:$4 sm:$0xff]  }
  0x33   : > { %943 = vmatprep.subr.bf16.mxu1 %v1962_v39  ;;  %v2048_v39 = vld [vmem:[%s2693_s5 + $0x10c] ss:$16 sps:$4 sm:$0xff]  }
  0x34   : > { %903 = vmatpush1.bf16.msra.mxu0 %v1946_v36  ;;  %v2037_v36 = vld [vmem:[%s2693_s5 + $0xe0] ss:$16 sps:$4 sm:$0xff]  }
  0x35   : > { %904 = vmatprep.subr.bf16.mxu0 %v1948_v37  ;;  %v2040_v37 = vld [vmem:[%s2693_s5 + $0xe8] ss:$16 sps:$4 sm:$0xff]  }
  0x36   : > { %944 = vmatpush1.bf16.msra.mxu1 %v1965_v44  ;;  %v2049_v44 = vld [vmem:[%s2693_s5 + $0x120] ss:$16 sps:$4 sm:$0xff]  }
  0x37   : > { %945 = vmatprep.subr.bf16.mxu1 %v1968_v46  ;;  %v2057_v46 = vld [vmem:[%s2693_s5 + $0x144] ss:$16 sps:$4 sm:$0xff]  }
  0x38   : > { %905 = vmatpush1.bf16.msra.mxu0 %v1952_v40  ;;  %v2043_v40 = vld [vmem:[%s2693_s5 + $0x100] ss:$16 sps:$4 sm:$0xff]  }
  0x39   : > { %906 = vmatprep.subr.bf16.mxu0 %v1954_v43  ;;  %v2054_v43 = vld [vmem:[%s2693_s5 + $0x12c] ss:$16 sps:$4 sm:$0xff]  }
  0x3a   : > { %946 = vmatpush1.bf16.msra.mxu1 %v1971_v49  ;;  %v2058_v49 = vld [vmem:[%s2693_s5 + $0x148] ss:$16 sps:$4 sm:$0xff]  }
  0x3b   : > { %947 = vmatprep.subr.bf16.mxu1 %v1974_v50  ;;  %v2063_v50 = vld [vmem:[%s2693_s5 + $0x164] ss:$16 sps:$4 sm:$0xff]  }
  0x3c   : > { %907 = vmatpush1.bf16.msra.mxu0 %v1958_v47  ;;  %v2060_v47 = vld [vmem:[%s2693_s5 + $0x14c] ss:$16 sps:$4 sm:$0xff]  }
  0x3d   : > { %908 = vmatprep.subr.bf16.mxu0 %v1960_v48  ;;  %v2055_v48 = vld [vmem:[%s2693_s5 + $0x140] ss:$16 sps:$4 sm:$0xff]  }
  0x3e   : > { %948 = vmatpush1.bf16.msra.mxu1 %v1977_v53  ;;  %v2064_v53 = vld [vmem:[%s2693_s5 + $0x168] ss:$16 sps:$4 sm:$0xff]  }
  0x3f   : > { %949 = vmatprep.subr.bf16.mxu1 %v1980_v54  ;;  %v2069_v54 = vld [vmem:[%s2693_s5 + $0x184] ss:$16 sps:$4 sm:$0xff]  }
  0x40   : > { %909 = vmatpush1.bf16.msra.mxu0 %v1964_v51  ;;  %v2066_v51 = vld [vmem:[%s2693_s5 + $0x16c] ss:$16 sps:$4 sm:$0xff]  }
  0x41   : > { %910 = vmatprep.subr.bf16.mxu0 %v1966_v52  ;;  %v2061_v52 = vld [vmem:[%s2693_s5 + $0x160] ss:$16 sps:$4 sm:$0xff]  }
  0x42   : > { %950 = vmatpush1.bf16.msra.mxu1 %v1983_v59  ;;  %v2075_v59 = vld [vmem:[%s2693_s5 + $0x1a4] ss:$16 sps:$4 sm:$0xff]  }
  0x43   : > { %951 = vmatprep.subr.bf16.mxu1 %v1986_v61  ;;  %v2078_v61 = vld [vmem:[%s2693_s5 + $0x1ac] ss:$16 sps:$4 sm:$0xff]  }
  0x44   : > { %911 = vmatpush1.bf16.msra.mxu0 %v1970_v57  ;;  %v2070_v57 = vld [vmem:[%s2693_s5 + $0x188] ss:$16 sps:$4 sm:$0xff]  }
  0x45   : > { %912 = vmatprep.subr.bf16.mxu0 %v1972_v58  ;;  %v2073_v58 = vld [vmem:[%s2693_s5 + $0x1a0] ss:$16 sps:$4 sm:$0xff]  }
  0x46   : > { %952 = vmatpush1.bf16.msra.mxu1 %v1988_v63  ;;  %v2084_v63 = vld [vmem:[%s2693_s5 + $0x1cc] ss:$16 sps:$4 sm:$0xff]  }
  0x47   : > { %953 = vmatprep.subr.bf16.mxu1 %v1989_v0  ;;  %v2079_v0 = vld [vmem:[%s2693_s5 + $0x1c0] ss:$16 sps:$4 sm:$0xff]  }
  0x48   : > { %913 = vmatpush1.bf16.msra.mxu0 %v1976_v60  ;;  %v2076_v60 = vld [vmem:[%s2693_s5 + $0x1a8] ss:$16 sps:$4 sm:$0xff]  }
  0x49   : > { %914 = vmatprep.subr.bf16.mxu0 %v1978_v62  ;;  %v2081_v62 = vld [vmem:[%s2693_s5 + $0x1c4] ss:$16 sps:$4 sm:$0xff]  }
  0x4a   : > { %954 = vmatpush1.bf16.msra.mxu1 %v1991_v2  ;;  %v1772_v2 = vld [vmem:[%s2688_s0 + $0x8] sm:$0xff] }
  0x4b   : > { %955 = vmatprep.subr.bf16.mxu1 %v1992_v4  ;;  %v2090_v4 = vld [vmem:[%s2693_s5 + $0x1ec] ss:$16 sps:$4 sm:$0xff]  }
  0x4c   : > { %915 = vmatpush1.bf16.msra.mxu0 %v1982_v1  ;;  %v2082_v1 = vld [vmem:[%s2693_s5 + $0x1c8] ss:$16 sps:$4 sm:$0xff]  }
  0x4d   : > { %1412 = vmatprep.subr.bf16.mxu0 %v1997_v3  ;;  %v2087_v3 = vld [vmem:[%s2693_s5 + $0x1e4] ss:$16 sps:$4 sm:$0xff]  }
  0x4e   : > { %956 = vmatpush1.bf16.msra.mxu1 %v1994_v7  ;;  %v2088_v7 = vld [vmem:[%s2693_s5 + $0x1e8] ss:$16 sps:$4 sm:$0xff]  }
  0x4f   : > { %917 = vmatmul.mubr.bf16.vlgmr.msra.gmra.mrb[0].mxu0 %v1703_v6  ;;  %1453 = vmatprep.subr.bf16.mxu1 %v2000_v9 }
  0x50   : > { %1413 = vmatpush1.bf16.msra.mxu0 %v1995_v5  ;;  %v1856_v5 = vpack.c.bf16 %v1772_v2, %v1772_v2 }
  0x51   : > { %1414 = vmatprep.subr.bf16.mxu0 %v2003_v8  ;;  %958 = vmatmul.mubr.bf16.vlgmr.msra.gmra.mrb[0].mxu1 %v1703_v6  ;;  %v2085_v6 = vld [vmem:[%s2693_s5 + $0x1e0] ss:$16 sps:$4 sm:$0xff]   ;;  %v537_v8 = vlaneseq }
  0x52   : > { %1454 = vmatpush1.bf16.msra.mxu1 %v1998_v11  ;;  %1444 = vmatprep.mubr.bf16.mxu0 %v1856_v5  ;;  %v535_v11 = vld [vmem:[%s2692_s4] sm:$0xf] }
  0x53   : > { %1455 = vmatprep.subr.bf16.mxu1 %v2006_v13  ;;  %1485 = vmatprep.mubr.bf16.mxu1 %v1856_v5  ;;  %v2627_v9 = vshrl.u32 %v537_v8, 7 }
  0x54   : > { %1415 = vmatpush1.bf16.msra.mxu0 %v2001_v10 }
  0x55   : > { %1416 = vmatprep.subr.bf16.mxu0 %v2009_v12  ;;  %v539_v10 = vsub.s32 0, %v2627_v9  ;;  %v543_v12 = vsub.s32 1, %v2627_v9 }
  0x56   : > { %1456 = vmatpush1.bf16.msra.mxu1 %v2004_v15  ;;  %v551_v15 = vsub.s32 3, %v2627_v9 }
  0x57   : > { %1457 = vmatprep.subr.bf16.mxu1 %v2012_v17  ;;  %v540_v13 = vrot.slane %v535_v11, %v539_v10 }
  0x58   : > { %1417 = vmatpush1.bf16.msra.mxu0 %v2007_v14  ;;  %v544_v14 = vrot.slane %v535_v11, %v543_v12 }
  0x59   : > { %1418 = vmatprep.subr.bf16.mxu0 %v2015_v16 }
  0x5a   : > { %1458 = vmatpush1.bf16.msra.mxu1 %v2010_v19 }
  0x5b   : > { %1459 = vmatprep.subr.bf16.mxu1 %v2018_v20 }
  0x5c   : > { %1419 = vmatpush1.bf16.msra.mxu0 %v2013_v18 }
  0x5d   : > { %1420 = vmatprep.subr.bf16.mxu0 %v2021_v22 }
  0x5e   : > { %1460 = vmatpush1.bf16.msra.mxu1 %v2016_v21 }
  0x5f   : > { %1461 = vmatprep.subr.bf16.mxu1 %v2024_v23  ;;  %v552_v23 = vrot.slane %v535_v11, %v551_v15 }
  0x60   : > { %1421 = vmatpush1.bf16.msra.mxu0 %v2019_v24 }
  0x61   : > { %1422 = vmatprep.subr.bf16.mxu0 %v2027_v26 }
  0x62   : > { %1462 = vmatpush1.bf16.msra.mxu1 %v2022_v25  ;;  %v547_v25 = vsub.s32 2, %v2627_v9 }
  0x63   : > { %1463 = vmatprep.subr.bf16.mxu1 %v2030_v27 }
  0x64   : > { %1423 = vmatpush1.bf16.msra.mxu0 %v2025_v28 }
  0x65   : > { %1424 = vmatprep.subr.bf16.mxu0 %v2033_v30  ;;  %v548_v30 = vrot.slane %v535_v11, %v547_v25 }
  0x66   : > { %1464 = vmatpush1.bf16.msra.mxu1 %v2028_v29 }
  0x67   : > { %1465 = vmatprep.subr.bf16.mxu1 %v2036_v31 }
  0x68   : > { %1425 = vmatpush1.bf16.msra.mxu0 %v2031_v32 }
  0x69   : > { %1426 = vmatprep.subr.bf16.mxu0 %v2039_v34 }
  0x6a   : > { %1466 = vmatpush1.bf16.msra.mxu1 %v2034_v33 }
  0x6b   : > { %1467 = vmatprep.subr.bf16.mxu1 %v2042_v35 }
  0x6c   : > { %1427 = vmatpush1.bf16.msra.mxu0 %v2037_v36 }
  0x6d   : > { %1428 = vmatprep.subr.bf16.mxu0 %v2045_v38 }
  0x6e   : > { %1468 = vmatpush1.bf16.msra.mxu1 %v2040_v37 }
  0x6f   : > { %1469 = vmatprep.subr.bf16.mxu1 %v2048_v39 }
  0x70   : > { %1429 = vmatpush1.bf16.msra.mxu0 %v2043_v40  ;;  %v470_v40 = vld [vmem:[%s2689_s1] sm:$0xff] }
  0x71   : > { %1430 = vmatprep.subr.bf16.mxu0 %v2051_v42 }
  0x72   : > { %1470 = vmatpush1.bf16.msra.mxu1 %v2046_v41 }
  0x73   : > { %1471 = vmatprep.subr.bf16.mxu1 %v2054_v43 }
  0x74   : > { %1431 = vmatpush1.bf16.msra.mxu0 %v2049_v44 }
  0x75   : > { %1432 = vmatprep.subr.bf16.mxu0 %v2057_v46 }
  0x76   : > { %1472 = vmatpush1.bf16.msra.mxu1 %v2052_v45 }
  0x77   : > { %1473 = vmatprep.subr.bf16.mxu1 %v2060_v47 }
  0x78   : > { %1433 = vmatpush1.bf16.msra.mxu0 %v2055_v48 }
  0x79   : > { %1434 = vmatprep.subr.bf16.mxu0 %v2063_v50 }
  0x7a   : > { %1474 = vmatpush1.bf16.msra.mxu1 %v2058_v49 }
  0x7b   : > { %1475 = vmatprep.subr.bf16.mxu1 %v2066_v51  ;;  %v2131_v51 = vmov -inf  }
  0x7c   : > { %1435 = vmatpush1.bf16.msra.mxu0 %v2061_v52  ;;  %1527 = vst.msk [vmem:[%s2701_s13] sm:$0xff] %vm1526_vm0, %v2131_v51  ;;  %v1063_v52 = vld [vmem:[%s2694_s6] sm:$0xf] }
  0x7d   : > { %1436 = vmatprep.subr.bf16.mxu0 %v2069_v54  ;;  %v1072_v54 = vrot.slane %v1063_v52, %v543_v12  ;;  %v1076_v5 = vrot.slane %v1063_v52, %v547_v25 }
  0x7e   : > { %1476 = vmatpush1.bf16.msra.mxu1 %v2064_v53  ;;  %v1068_v53 = vrot.slane %v1063_v52, %v539_v10 }
  0x7f   : > { %1477 = vmatprep.subr.bf16.mxu1 %v2072_v55 }
  0x80   : > { %1437 = vmatpush1.bf16.msra.mxu0 %v2067_v56 }
  0x81   : > { %1438 = vmatprep.subr.bf16.mxu0 %v2075_v59 }
  0x82   : > { %1478 = vmatpush1.bf16.msra.mxu1 %v2070_v57 }
  0x83   : > { %1479 = vmatprep.subr.bf16.mxu1 %v2078_v61 }
  0x84   : > { %1439 = vmatpush1.bf16.msra.mxu0 %v2073_v58 }
  0x85   : > { %1440 = vmatprep.subr.bf16.mxu0 %v2081_v62 }
  0x86   : > { %1480 = vmatpush1.bf16.msra.mxu1 %v2076_v60 }
  0x87   : > { %1481 = vmatprep.subr.bf16.mxu1 %v2084_v63 }
  0x88   : > { %1441 = vmatpush1.bf16.msra.mxu0 %v2079_v0 }
  0x89   : > { %1442 = vmatprep.subr.bf16.mxu0 %v2087_v3  ;;  %v1080_v3 = vrot.slane %v1063_v52, %v551_v15 }
  0x8a   : > { %1482 = vmatpush1.bf16.msra.mxu1 %v2082_v1 }
  0x8b   : > { %1483 = vmatprep.subr.bf16.mxu1 %v2090_v4 }
  0x8c   : > { %1443 = vmatpush1.bf16.msra.mxu0 %v2085_v6 }
  0x8e   : > { %1484 = vmatpush1.bf16.msra.mxu1 %v2088_v7 }
 0x122   : > { %v918_v16 = vpop.f32.mrb[0].mxu0 }
 0x123   : > { %v919_v17 = vadd.f32 %v918_v16, %v540_v13  ;;  %v920_v18 = vpop.f32.mrb[1].mxu0 }
 0x124   : > { %v921_v19 = vadd.f32 %v920_v18, %v544_v14  ;;  %v922_v20 = vpop.f32.mrb[2].mxu0  ;;  %v959_v26 = vpop.f32.mrb[0].mxu1 }
 0x125   : > { %v1769_v21 = vmul.f32 -1.442695, %v919_v17  ;;  %v923_v22 = vpop.f32.mrb[3].mxu0  ;;  %v961_v27 = vpop.f32.mrb[1].mxu1  ;;  %v960_v33 = vadd.f32 %v959_v26, %v548_v30 }
 0x126   : > { %v1770_v24 = vmul.f32 -1.442695, %v921_v19  ;;  %v962_v28 = vadd.f32 %v961_v27, %v552_v23  ;;  %v963_v29 = vpop.f32.mrb[2].mxu1 }
 0x127   : > { %2091 = vpow2.f32 %v1769_v21  ;;  %v964_v31 = vpop.f32.mrb[3].mxu1 }
 0x128   : > { %2093 = vpow2.f32 %v1770_v24  ;;  %v1771_v32 = vmul.f32 -1.442695, %v962_v28 }
 0x12a   : > { %2095 = vpow2.f32 %v1771_v32 }
 0x12b   : > { %2097 = vtanh.f32 %v960_v33 }
 0x131   : > { %v2092_v34 = vpop.eup %2091 }
 0x132   : > { %v2094_v35 = vpop.eup %2093  ;;  %v969_v36 = vadd.f32 1.0, %v2092_v34 }
 0x133   : > { %v975_v37 = vadd.f32 1.0, %v2094_v35 }
 0x134   : > { %2099 = vrcp.f32 %v969_v36  ;;  %v2096_v38 = vpop.eup %2095 }
 0x135   : > { %2101 = vrcp.f32 %v975_v37  ;;  %v2098_v39 = vpop.eup %2097  ;;  %v982_v42 = vadd.f32 1.0, %v2096_v38 }
 0x137   : > { %2103 = vrcp.f32 %v982_v42 }
 0x13e   : > { %v2100_v41 = vpop.eup %2099 }
 0x13f   : > { %v2102_v43 = vpop.eup %2101  ;;  %v986_v44 = vmul.f32 %v2100_v41, %v2098_v39 }
 0x140   : > { %v985_v45 = vmul.f32 %v2102_v43, %v470_v40 }
 0x141   : > { %v2104_v47 = vpop.eup %2103 }
 0x142   : > { %v987_v46 = vadd.f32 %v986_v44, %v985_v45 }
 0x144   : > { %2105 = vtanh.f32 %v987_v46  ;;  %1521 = vst [vmem:[%s2700_s12] sm:$0xff] %v987_v46 }
 0x14b   : > { %v1773_v9 = vld [vmem:[%s2689_s1 + $0x8] sm:$0xff] }
 0x14e   : > { %v2106_v48 = vpop.eup %2105 }
 0x14f   : > { %v989_v49 = vmul.f32 %v2106_v48, %v2104_v47 }
 0x151   : > { %v1855_v50 = vpack.c.bf16 %v989_v49, %v989_v49  ;;  %1518 = vst [vmem:[%s2699_s11] sm:$0xff] %v989_v49 }
 0x153   : > { %1445 = vmatmul.mubr.bf16.vlgmr.msra.gmra.mrb[4].mxu0 %v1855_v50  ;;  %1486 = vmatmul.mubr.bf16.vlgmr.msra.gmra.mrb[4].mxu1 %v1855_v50 }
 0x226   : > { %v1446_v55 = vpop.f32.mrb[4].mxu0  ;;  %v1487_v56 = vpop.f32.mrb[4].mxu1 }
 0x227   : > { %v1447_v57 = vadd.f32 %v1446_v55, %v1068_v53  ;;  %v1448_v58 = vpop.f32.mrb[5].mxu0  ;;  %v1489_v59 = vpop.f32.mrb[5].mxu1  ;;  %v1488_v7 = vadd.f32 %v1487_v56, %v1076_v5 }
 0x228   : > { %v1449_v60 = vadd.f32 %v1448_v58, %v1072_v54  ;;  %v1450_v61 = vpop.f32.mrb[6].mxu0  ;;  %v1491_v62 = vpop.f32.mrb[6].mxu1  ;;  %v1490_v4 = vadd.f32 %v1489_v59, %v1080_v3 }
 0x229   : > { %v1840_v63 = vmul.f32 -1.442695, %v1447_v57  ;;  %v1451_v0 = vpop.f32.mrb[7].mxu0  ;;  %v1492_v1 = vpop.f32.mrb[7].mxu1 }
 0x22a   : > { %v1841_v2 = vmul.f32 -1.442695, %v1449_v60  ;;  %v1842_v6 = vmul.f32 -1.442695, %v1490_v4 }
 0x22b   : > { %2107 = vpow2.f32 %v1840_v63 }
 0x22c   : > { %2109 = vpow2.f32 %v1841_v2 }
 0x22d   : > { %2111 = vpow2.f32 %v1842_v6 }
 0x22e   : > { %2113 = vtanh.f32 %v1488_v7 }
 0x235   : > { %v2108_v8 = vpop.eup %2107 }
 0x236   : > { %v2110_v10 = vpop.eup %2109  ;;  %v1497_v11 = vadd.f32 1.0, %v2108_v8 }
 0x237   : > { %v1503_v12 = vadd.f32 1.0, %v2110_v10  ;;  %v2112_v13 = vpop.eup %2111 }
 0x238   : > { %2115 = vrcp.f32 %v1497_v11  ;;  %v2114_v14 = vpop.eup %2113  ;;  %v1510_v18 = vadd.f32 1.0, %v2112_v13 }
 0x239   : > { %2117 = vrcp.f32 %v1503_v12 }
 0x23a   : > { %2119 = vrcp.f32 %v1510_v18 }
 0x242   : > { %v2116_v15 = vpop.eup %2115 }
 0x243   : > { %v2118_v16 = vpop.eup %2117  ;;  %v1514_v17 = vmul.f32 %v2116_v15, %v2114_v14 }
 0x244   : > { %v1513_v19 = vmul.f32 %v2118_v16, %v1773_v9  ;;  %v2120_v21 = vpop.eup %2119 }
 0x246   : > { %v1515_v20 = vadd.f32 %v1514_v17, %v1513_v19 }
 0x248   : > { %2121 = vtanh.f32 %v1515_v20  ;;  %1844 = vst [vmem:[%s2700_s12 + $0x8] sm:$0xff] %v1515_v20 }
 0x252   : > { %v2122_v22 = vpop.eup %2121 }
 0x253   : > { %v1517_v23 = vmul.f32 %v2122_v22, %v2120_v21 }
 0x255   : > { %1843 = vst [vmem:[%s2699_s11 + $0x8] sm:$0xff] %v1517_v23  ;;  %v1524_v24 = vpack.c.bf16 %v1517_v23, %v1517_v23 }
 0x257   : > { %1525 = vst [vmem:[#allocation4] sm:$0xf] %v1524_v24 }
 0x258 PF: > { %v1528_v25 = vld [vmem:[%s2222_s17] sm:$0xff]  ;;  %v2132_v26 = vmov 0.0   ;;  %vm2133_vm1 = vmmov 0   ;;  %v1529_v29 = vld [vmem:[%s2222_s17 + $0x8] sm:$0xff]  ;;  %v1530_v32 = vld [vmem:[%s2222_s17 + $0x10] sm:$0xff]  ;;  %vm1603_vm2 = vcmask 7168  }
 0x259   : > { %1866 = vmatprep.subr.bf16.mxu0 %v2132_v26  ;;  %v1532_v27 = vunpack.c.l.s8.bf16 %v1528_v25  ;;  %1882 = vmatprep.mubr.msk.bf16.mxu0 %vm2133_vm1, %v2132_v26  ;;  %v1533_v28 = vunpack.c.h.s8.bf16 %v1528_v25  ;;  %v1534_v30 = vunpack.c.l.s8.bf16 %v1529_v29  ;;  %v1535_v31 = vunpack.c.h.s8.bf16 %v1529_v29  ;;  %v1531_v35 = vld [vmem:[%s2222_s17 + $0x18] sm:$0xff]  ;;  %v1845_v39 = vld [vmem:[%s451_s14] ss:$0 sm:$0xff] }
 0x25a   : > { %v1536_v33 = vunpack.c.l.s8.bf16 %v1530_v32  ;;  %v1537_v34 = vunpack.c.h.s8.bf16 %v1530_v32  ;;  %v1538_v36 = vunpack.c.l.s8.bf16 %v1531_v35  ;;  %v1539_v37 = vunpack.c.h.s8.bf16 %v1531_v35  ;;  %v1846_v41 = vld [vmem:[%s454_s20] ss:$0 sm:$0xff] }
 0x25b   : > { %1867 = vmatpush3.bf16.msra.mxu0 %v1532_v27  ;;  %v1599_v48 = vld [vmem:[%s2701_s13] sm:$0xff] }
 0x25c   : > { %1868 = vmatprep.subr.bf16.mxu0 %v2132_v26 }
 0x25e   : > { %v1540_v38 = vld [vmem:[#allocation4] sm:$0xf] }
 0x25f   : > { %1869 = vmatpush3.bf16.msra.mxu0 %v1533_v28 }
 0x260   : > { %1870 = vmatprep.subr.bf16.mxu0 %v2132_v26 }
 0x263   : > { %1871 = vmatpush3.bf16.msra.mxu0 %v1534_v30 }
 0x264   : > { %1872 = vmatprep.subr.bf16.mxu0 %v2132_v26 }
 0x267   : > { %1873 = vmatpush3.bf16.msra.mxu0 %v1535_v31 }
 0x268   : > { %1874 = vmatprep.subr.bf16.mxu0 %v2132_v26 }
 0x26b   : > { %1875 = vmatpush3.bf16.msra.mxu0 %v1536_v33 }
 0x26c   : > { %1876 = vmatprep.subr.bf16.mxu0 %v2132_v26 }
 0x26f   : > { %1877 = vmatpush3.bf16.msra.mxu0 %v1537_v34 }
 0x270   : > { %1878 = vmatprep.subr.bf16.mxu0 %v2132_v26 }
 0x273   : > { %1879 = vmatpush3.bf16.msra.mxu0 %v1538_v36 }
 0x274   : > { %1880 = vmatprep.subr.bf16.mxu0 %v2132_v26 }
 0x277   : > { %1881 = vmatpush3.bf16.msra.mxu0 %v1539_v37 }
 0x27a   : > { %1883 = vmatmul.mubr.bf16.vlgmr.msra.gmra.mrb[0].mxu0 %v1540_v38 }
 0x34d   : > { %v1575_v40 = vpop.f32.mrb[0].mxu0 }
 0x34e   : > { %v1588_v42 = vmul.f32 %v1845_v39, %v1575_v40  ;;  %v1884_v43 = vpop.f32.mrb[1].mxu0 }
 0x34f   : > { %v1578_v44 = vpop.f32.mrb[2].mxu0 }
 0x350   : > { %v1885_v45 = vpop.f32.mrb[3].mxu0  ;;  %v1596_v46 = vadd.f32 %v1846_v41, %v1588_v42 }
 0x352   : > { %v1597_v47 = vpack.c.bf16 %v1596_v46, %v1596_v46  ;;  %1600 = vmax.xlane.f32.xlu0 %v1596_v46 }
 0x354   : > { %1598 = vst [vmem:[%s2232_s24] sm:$0xf] %v1597_v47 }
 0x3df   : > { %v1601_v49 = vpop.xlane.xlu0 %1600 }
 0x3e0   : > { %v1602_v50 = vmax.f32 %v1599_v48, %v1601_v49 }
 0x3e2   : > { %1604 = vst.msk [vmem:[%s2701_s13] sm:$0xff] %vm1603_vm2, %v1602_v50 }
 0x3e3 PF: > { %s2704_s27 = sld [smem:[#allocation5_spill]] }
 0x3e9   : > { %s24_s25 = sadd.s32 1, %s2704_s27  }
 0x3ea   : > { %p21_p5 = scmp.ge.s32.totalorder %s24_s25, 4  }
 0x3ec   :  { %23 = sbr.rel (!%p21_p5) target bundleno = 1 (0x1), region = 128 }

// kernel: step.1
= control target key start
LH: loop header
LB: loop body
LE: loop exit
PB: predicated region body
PF: predicated region fallthrough
CT: control target
= control target key end

     0   :  { %s2204_s25 = smov 0   ;;  %s2688_s0 = inlined_call_operand.vmem [shape: f32[2,8,128], index: 0, kind: input, shape index: {}, may-alias: {0,11}]   ;;  %s2689_s1 = inlined_call_operand.vmem [shape: f32[2,8,128], index: 1, kind: input, shape index: {}, may-alias: {1,12}]   ;;  %s2690_s2 = inlined_call_operand.vmem [shape: bf16[8,128], index: 2, kind: input, shape index: {}]   ;;  %s2691_s3 = inlined_call_operand.vmem [shape: bf16[256,512], index: 3, kind: input, shape index: {}]   ;;  %s2692_s4 = inlined_call_operand.vmem [shape: f32[1,512], index: 4, kind: input, shape index: {}]   ;;  %s2693_s5 = inlined_call_operand.vmem [shape: bf16[256,512], index: 5, kind: input, shape index: {}]   ;;  %s2694_s6 = inlined_call_operand.vmem [shape: f32[1,512], index: 6, kind: input, shape index: {}]   ;;  %s2695_s7 = inlined_call_operand.vmem [shape: s8[2,128,128], index: 7, kind: input, shape index: {}]   ;;  %s2696_s8 = inlined_call_operand.vmem [shape: f32[1,256], index: 8, kind: input, shape index: {}]   ;;  %s2697_s9 = inlined_call_operand.vmem [shape: f32[1,256], index: 9, kind: input, shape index: {}]   ;;  %s2698_s10 = inlined_call_operand.vmem [shape: bf16[8,256], index: 10, kind: output, shape index: {0}]   ;;  %s2699_s11 = inlined_call_operand.vmem [shape: f32[2,8,128], index: 11, kind: output, shape index: {1}, may-alias: {0,11}]   ;;  %s2700_s12 = inlined_call_operand.vmem [shape: f32[2,8,128], index: 12, kind: output, shape index: {2}, may-alias: {1,12}]   ;;  %s2701_s13 = inlined_call_operand.vmem [shape: f32[8,1], index: 13, kind: output, shape index: {3}]  }
   0x1 LB: > { %2703 = sst [smem:[#allocation5_spill]] %s2129_s25  ;;  %s1694_s26 = sadd.s32 4294967295, %s2129_s25   ;;  %s2129_s25 = sphi %s2204_s25, %s24_s25  }
   0x2   : > { %p1698_p0 = scmp.ge.s32.totalorder %s2129_s25, 1  ;;  %p395_p1 = scmp.lt.s32.totalorder %s2129_s25, 3 }
   0x4   : > { %p396_p2 = pnand %p1698_p0, %p395_p1 }
   0x5   : > { %p444_p3 = scmp.lt.s32.totalorder (!%p396_p2), %s1694_s26, 1  ;;  %p1702_p4 = scmp.ne.s32.totalorder (!%p396_p2), %s1694_s26, 0 }
   0x6   : > { %399 = sbr.rel (%p396_p2) target bundleno = 995 (0x3e3), region = 60 }
   0xd   : > { %s2212_s27 = scalar_select %p444_p3, %s1694_s26, 1 }
   0xe   : > { %463 = sbr.rel (%p1702_p4) target bundleno = 600 (0x258), region = 64  ;;  %v1897_v0 = vld [vmem:[%s2691_s3 + $0x4] ss:$16 sps:$4 sm:$0xff] (!%p1702_p4)   ;;  %v1899_v1 = vld [vmem:[%s2691_s3] ss:$16 sps:$4 sm:$0xff] (!%p1702_p4)   ;;  %vm1526_vm0 = vcmask (!%p1702_p4), 7168  }
   0xf   : > { %s1849_s28 = sshll.u32 %s2212_s27, 5  ;;  %s451_s14 = scalar_lea.vmem %s2696_s8, %s2212_s27  ;;  %884 = vmatprep.subr.bf16.mxu0 (!%p1702_p4), %v1897_v0  ;;  %v1900_v2 = vld [vmem:[%s2691_s3 + $0x24] ss:$16 sps:$4 sm:$0xff] (!%p1702_p4)   ;;  %v1902_v3 = vld [vmem:[%s2691_s3 + $0x20] ss:$16 sps:$4 sm:$0xff] (!%p1702_p4)  }
  0x10   : > { %s2222_s17 = scalar_lea.vmem %s2695_s7, %s1849_s28  ;;  %s454_s20 = scalar_lea.vmem %s2697_s9, %s2212_s27  ;;  %885 = vmatpush1.bf16.msra.mxu0 (!%p1702_p4), %v1899_v1  ;;  %v1903_v4 = vld [vmem:[%s2691_s3 + $0x44] ss:$16 sps:$4 sm:$0xff] (!%p1702_p4)   ;;  %v1908_v5 = vld [vmem:[%s2691_s3 + $0xc] ss:$16 sps:$4 sm:$0xff] (!%p1702_p4)   ;;  %v1911_v6 = vld [vmem:[%s2691_s3 + $0x8] ss:$16 sps:$4 sm:$0xff] (!%p1702_p4)  }
  0x11   : > { %s1701_s21 = sshll.u32 %s2212_s27, 2  ;;  %886 = vmatprep.subr.bf16.mxu0 (!%p1702_p4), %v1900_v2  ;;  %v1905_v7 = vld [vmem:[%s2691_s3 + $0x40] ss:$16 sps:$4 sm:$0xff] (!%p1702_p4)   ;;  %925 = vmatprep.subr.bf16.mxu1 (!%p1702_p4), %v1908_v5  ;;  %v1906_v8 = vld [vmem:[%s2691_s3 + $0x64] ss:$16 sps:$4 sm:$0xff] (!%p1702_p4)  }
  0x12   : > { %s2232_s24 = scalar_lea.vmem %s2698_s10, %s1701_s21  ;;  %926 = vmatpush1.bf16.msra.mxu1 (!%p1702_p4), %v1911_v6  ;;  %v1914_v9 = vld [vmem:[%s2691_s3 + $0x2c] ss:$16 sps:$4 sm:$0xff] (!%p1702_p4)   ;;  %v1917_v10 = vld [vmem:[%s2691_s3 + $0x28] ss:$16 sps:$4 sm:$0xff] (!%p1702_p4)   ;;  %v1910_v11 = vld [vmem:[%s2691_s3 + $0x60] ss:$16 sps:$4 sm:$0xff] (!%p1702_p4)  }
  0x13   : > { %927 = vmatprep.subr.bf16.mxu1 (!%p1702_p4), %v1914_v9  ;;  %v1912_v12 = vld [vmem:[%s2691_s3 + $0x84] ss:$16 sps:$4 sm:$0xff] (!%p1702_p4)   ;;  %v1920_v13 = vld [vmem:[%s2691_s3 + $0x4c] ss:$16 sps:$4 sm:$0xff] (!%p1702_p4)   ;;  %v1923_v14 = vld [vmem:[%s2691_s3 + $0x48] ss:$16 sps:$4 sm:$0xff] (!%p1702_p4)  }
  0x14   : > { %887 = vmatpush1.bf16.msra.mxu0 (!%p1702_p4), %v1902_v3  ;;  %v1926_v15 = vld [vmem:[%s2691_s3 + $0x6c] ss:$16 sps:$4 sm:$0xff] (!%p1702_p4)   ;;  %v1916_v16 = vld [vmem:[%s2691_s3 + $0x80] ss:$16 sps:$4 sm:$0xff] (!%p1702_p4)   ;;  %v1918_v17 = vld [vmem:[%s2691_s3 + $0xa4] ss:$16 sps:$4 sm:$0xff] (!%p1702_p4)  }
  0x15   : > { %888 = vmatprep.subr.bf16.mxu0 %v1903_v4  ;;  %v1929_v18 = vld [vmem:[%s2691_s3 + $0x68] ss:$16 sps:$4 sm:$0xff]   ;;  %v1932_v19 = vld [vmem:[%s2691_s3 + $0x8c] ss:$16 sps:$4 sm:$0xff]   ;;  %v1922_v20 = vld [vmem:[%s2691_s3 + $0xa0] ss:$16 sps:$4 sm:$0xff]  }
  0x16   : > { %928 = vmatpush1.bf16.msra.mxu1 %v1917_v10  ;;  %v1924_v21 = vld [vmem:[%s2691_s3 + $0xc4] ss:$16 sps:$4 sm:$0xff]   ;;  %v1935_v22 = vld [vmem:[%s2691_s3 + $0x88] ss:$16 sps:$4 sm:$0xff]   ;;  %v1938_v23 = vld [vmem:[%s2691_s3 + $0xac] ss:$16 sps:$4 sm:$0xff]  }
  0x17   : > { %929 = vmatprep.subr.bf16.mxu1 %v1920_v13  ;;  %v1928_v24 = vld [vmem:[%s2691_s3 + $0xc0] ss:$16 sps:$4 sm:$0xff]   ;;  %v1930_v25 = vld [vmem:[%s2691_s3 + $0xe4] ss:$16 sps:$4 sm:$0xff]   ;;  %v1941_v26 = vld [vmem:[%s2691_s3 + $0xa8] ss:$16 sps:$4 sm:$0xff]  }
  0x18   : > { %889 = vmatpush1.bf16.msra.mxu0 %v1905_v7  ;;  %v1944_v27 = vld [vmem:[%s2691_s3 + $0xcc] ss:$16 sps:$4 sm:$0xff]   ;;  %v1934_v28 = vld [vmem:[%s2691_s3 + $0xe0] ss:$16 sps:$4 sm:$0xff]   ;;  %v1936_v29 = vld [vmem:[%s2691_s3 + $0x104] ss:$16 sps:$4 sm:$0xff]  }
  0x19   : > { %890 = vmatprep.subr.bf16.mxu0 %v1906_v8  ;;  %v1947_v30 = vld [vmem:[%s2691_s3 + $0xc8] ss:$16 sps:$4 sm:$0xff]   ;;  %v1950_v31 = vld [vmem:[%s2691_s3 + $0xec] ss:$16 sps:$4 sm:$0xff]   ;;  %v1940_v32 = vld [vmem:[%s2691_s3 + $0x100] ss:$16 sps:$4 sm:$0xff]  }
  0x1a   : > { %930 = vmatpush1.bf16.msra.mxu1 %v1923_v14  ;;  %v1942_v33 = vld [vmem:[%s2691_s3 + $0x124] ss:$16 sps:$4 sm:$0xff]   ;;  %v1953_v34 = vld [vmem:[%s2691_s3 + $0xe8] ss:$16 sps:$4 sm:$0xff]   ;;  %v1956_v35 = vld [vmem:[%s2691_s3 + $0x10c] ss:$16 sps:$4 sm:$0xff]  }
  0x1b   : > { %931 = vmatprep.subr.bf16.mxu1 %v1926_v15  ;;  %v1946_v36 = vld [vmem:[%s2691_s3 + $0x120] ss:$16 sps:$4 sm:$0xff]   ;;  %v1948_v37 = vld [vmem:[%s2691_s3 + $0x144] ss:$16 sps:$4 sm:$0xff]   ;;  %v1959_v38 = vld [vmem:[%s2691_s3 + $0x108] ss:$16 sps:$4 sm:$0xff]  }
  0x1c   : > { %891 = vmatpush1.bf16.msra.mxu0 %v1910_v11  ;;  %v1962_v39 = vld [vmem:[%s2691_s3 + $0x12c] ss:$16 sps:$4 sm:$0xff]   ;;  %v1952_v40 = vld [vmem:[%s2691_s3 + $0x140] ss:$16 sps:$4 sm:$0xff]   ;;  %v1954_v43 = vld [vmem:[%s2691_s3 + $0x164] ss:$16 sps:$4 sm:$0xff]  }
  0x1d   : > { %892 = vmatprep.subr.bf16.mxu0 %v1912_v12  ;;  %v464_v41 = vld [vmem:[%s2690_s2] sm:$0xf]  ;;  %v1965_v44 = vld [vmem:[%s2691_s3 + $0x128] ss:$16 sps:$4 sm:$0xff]   ;;  %v1968_v46 = vld [vmem:[%s2691_s3 + $0x14c] ss:$16 sps:$4 sm:$0xff]  }
  0x1e   : > { %932 = vmatpush1.bf16.msra.mxu1 %v1929_v18  ;;  %465 = vst [vmem:[#allocation2] sm:$0xf] %v464_v41  ;;  %v466_v42 = vld [vmem:[%s2688_s0] sm:$0xff]  ;;  %v1971_v49 = vld [vmem:[%s2691_s3 + $0x148] ss:$16 sps:$4 sm:$0xff]  }
  0x1f   : > { %933 = vmatprep.subr.bf16.mxu1 %v1932_v19  ;;  %v467_v45 = vpack.c.bf16 %v466_v42, %v466_v42  ;;  %v1958_v47 = vld [vmem:[%s2691_s3 + $0x160] ss:$16 sps:$4 sm:$0xff]   ;;  %v1960_v48 = vld [vmem:[%s2691_s3 + $0x184] ss:$16 sps:$4 sm:$0xff]   ;;  %v1974_v50 = vld [vmem:[%s2691_s3 + $0x16c] ss:$16 sps:$4 sm:$0xff]  }
  0x20   : > { %893 = vmatpush1.bf16.msra.mxu0 %v1916_v16  ;;  %v1964_v51 = vld [vmem:[%s2691_s3 + $0x180] ss:$16 sps:$4 sm:$0xff]   ;;  %v1966_v52 = vld [vmem:[%s2691_s3 + $0x1a4] ss:$16 sps:$4 sm:$0xff]   ;;  %v1977_v53 = vld [vmem:[%s2691_s3 + $0x168] ss:$16 sps:$4 sm:$0xff]  }
  0x21   : > { %894 = vmatprep.subr.bf16.mxu0 %v1918_v17  ;;  %468 = vst [vmem:[#allocation2 + $0x4] sm:$0xf] %v467_v45  ;;  %v1980_v54 = vld [vmem:[%s2691_s3 + $0x18c] ss:$16 sps:$4 sm:$0xff]   ;;  %v1970_v57 = vld [vmem:[%s2691_s3 + $0x1a0] ss:$16 sps:$4 sm:$0xff]  }
  0x22   : > { %934 = vmatpush1.bf16.msra.mxu1 %v1935_v22  ;;  %v1972_v58 = vld [vmem:[%s2691_s3 + $0x1c4] ss:$16 sps:$4 sm:$0xff]   ;;  %v1983_v59 = vld [vmem:[%s2691_s3 + $0x188] ss:$16 sps:$4 sm:$0xff]   ;;  %v1976_v60 = vld [vmem:[%s2691_s3 + $0x1c0] ss:$16 sps:$4 sm:$0xff]  }
  0x23   : > { %935 = vmatprep.subr.bf16.mxu1 %v1938_v23  ;;  %v1986_v61 = vld [vmem:[%s2691_s3 + $0x1ac] ss:$16 sps:$4 sm:$0xff]   ;;  %v1978_v62 = vld [vmem:[%s2691_s3 + $0x1e4] ss:$16 sps:$4 sm:$0xff]   ;;  %v1988_v63 = vld [vmem:[%s2691_s3 + $0x1a8] ss:$16 sps:$4 sm:$0xff]  }
  0x24   : > { %895 = vmatpush1.bf16.msra.mxu0 %v1922_v20  ;;  %v1989_v0 = vld [vmem:[%s2691_s3 + $0x1cc] ss:$16 sps:$4 sm:$0xff]   ;;  %v1982_v1 = vld [vmem:[%s2691_s3 + $0x1e0] ss:$16 sps:$4 sm:$0xff]   ;;  %v1991_v2 = vld [vmem:[%s2691_s3 + $0x1c8] ss:$16 sps:$4 sm:$0xff]  }
  0x25   : > { %896 = vmatprep.subr.bf16.mxu0 %v1924_v21  ;;  %v1997_v3 = vld [vmem:[%s2693_s5 + $0x4] ss:$16 sps:$4 sm:$0xff]   ;;  %v1992_v4 = vld [vmem:[%s2691_s3 + $0x1ec] ss:$16 sps:$4 sm:$0xff]   ;;  %v1995_v5 = vld [vmem:[%s2693_s5] ss:$16 sps:$4 sm:$0xff]  }
  0x26   : > { %936 = vmatpush1.bf16.msra.mxu1 %v1941_v26  ;;  %v1994_v7 = vld [vmem:[%s2691_s3 + $0x1e8] ss:$16 sps:$4 sm:$0xff]   ;;  %v2003_v8 = vld [vmem:[%s2693_s5 + $0x24] ss:$16 sps:$4 sm:$0xff]   ;;  %v2000_v9 = vld [vmem:[%s2693_s5 + $0xc] ss:$16 sps:$4 sm:$0xff]  }
  0x27   : > { %937 = vmatprep.subr.bf16.mxu1 %v1944_v27  ;;  %v2001_v10 = vld [vmem:[%s2693_s5 + $0x20] ss:$16 sps:$4 sm:$0xff]   ;;  %v1998_v11 = vld [vmem:[%s2693_s5 + $0x8] ss:$16 sps:$4 sm:$0xff]   ;;  %v2009_v12 = vld [vmem:[%s2693_s5 + $0x44] ss:$16 sps:$4 sm:$0xff]  }
  0x28   : > { %897 = vmatpush1.bf16.msra.mxu0 %v1928_v24  ;;  %v469_v55 = vld [vmem:[#allocation2] sm:$0xff]  ;;  %v2006_v13 = vld [vmem:[%s2693_s5 + $0x2c] ss:$16 sps:$4 sm:$0xff]   ;;  %v2004_v15 = vld [vmem:[%s2693_s5 + $0x28] ss:$16 sps:$4 sm:$0xff]  }
  0x29   : > { %898 = vmatprep.subr.bf16.mxu0 %v1930_v25  ;;  %v1704_v56 = vcombine.high %v469_v55, %v469_v55  ;;  %v1703_v6 = vcombine.low %v469_v55, %v469_v55  ;;  %v2007_v14 = vld [vmem:[%s2693_s5 + $0x40] ss:$16 sps:$4 sm:$0xff]   ;;  %v2015_v16 = vld [vmem:[%s2693_s5 + $0x64] ss:$16 sps:$4 sm:$0xff]   ;;  %v2012_v17 = vld [vmem:[%s2693_s5 + $0x4c] ss:$16 sps:$4 sm:$0xff]  }
  0x2a   : > { %938 = vmatpush1.bf16.msra.mxu1 %v1947_v30  ;;  %v2013_v18 = vld [vmem:[%s2693_s5 + $0x60] ss:$16 sps:$4 sm:$0xff]   ;;  %v2010_v19 = vld [vmem:[%s2693_s5 + $0x48] ss:$16 sps:$4 sm:$0xff]   ;;  %v2018_v20 = vld [vmem:[%s2693_s5 + $0x6c] ss:$16 sps:$4 sm:$0xff]  }
  0x2b   : > { %939 = vmatprep.subr.bf16.mxu1 %v1950_v31  ;;  %916 = vmatprep.mubr.bf16.mxu0 %v1704_v56  ;;  %v2016_v21 = vld [vmem:[%s2693_s5 + $0x68] ss:$16 sps:$4 sm:$0xff]   ;;  %v2021_v22 = vld [vmem:[%s2693_s5 + $0x84] ss:$16 sps:$4 sm:$0xff]   ;;  %v2024_v23 = vld [vmem:[%s2693_s5 + $0x8c] ss:$16 sps:$4 sm:$0xff]  }
  0x2c   : > { %899 = vmatpush1.bf16.msra.mxu0 %v1934_v28  ;;  %957 = vmatprep.mubr.bf16.mxu1 %v1704_v56  ;;  %v2019_v24 = vld [vmem:[%s2693_s5 + $0x80] ss:$16 sps:$4 sm:$0xff]   ;;  %v2022_v25 = vld [vmem:[%s2693_s5 + $0x88] ss:$16 sps:$4 sm:$0xff]   ;;  %v2027_v26 = vld [vmem:[%s2693_s5 + $0xa4] ss:$16 sps:$4 sm:$0xff]  }
  0x2d   : > { %900 = vmatprep.subr.bf16.mxu0 %v1936_v29  ;;  %v2030_v27 = vld [vmem:[%s2693_s5 + $0xac] ss:$16 sps:$4 sm:$0xff]   ;;  %v2025_v28 = vld [vmem:[%s2693_s5 + $0xa0] ss:$16 sps:$4 sm:$0xff]   ;;  %v2028_v29 = vld [vmem:[%s2693_s5 + $0xa8] ss:$16 sps:$4 sm:$0xff]  }
  0x2e   : > { %940 = vmatpush1.bf16.msra.mxu1 %v1953_v34  ;;  %v2033_v30 = vld [vmem:[%s2693_s5 + $0xc4] ss:$16 sps:$4 sm:$0xff]   ;;  %v2036_v31 = vld [vmem:[%s2693_s5 + $0xcc] ss:$16 sps:$4 sm:$0xff]   ;;  %v2046_v41 = vld [vmem:[%s2693_s5 + $0x108] ss:$16 sps:$4 sm:$0xff]  }
  0x2f   : > { %941 = vmatprep.subr.bf16.mxu1 %v1956_v35  ;;  %v2039_v34 = vld [vmem:[%s2693_s5 + $0xe4] ss:$16 sps:$4 sm:$0xff]   ;;  %v2042_v35 = vld [vmem:[%s2693_s5 + $0xec] ss:$16 sps:$4 sm:$0xff]   ;;  %v2052_v45 = vld [vmem:[%s2693_s5 + $0x128] ss:$16 sps:$4 sm:$0xff]  }
  0x30   : > { %901 = vmatpush1.bf16.msra.mxu0 %v1940_v32  ;;  %v2031_v32 = vld [vmem:[%s2693_s5 + $0xc0] ss:$16 sps:$4 sm:$0xff]   ;;  %v2051_v42 = vld [vmem:[%s2693_s5 + $0x124] ss:$16 sps:$4 sm:$0xff]   ;;  %v2072_v55 = vld [vmem:[%s2693_s5 + $0x18c] ss:$16 sps:$4 sm:$0xff]  }
  0x31   : > { %902 = vmatprep.subr.bf16.mxu0 %v1942_v33  ;;  %v2034_v33 = vld [vmem:[%s2693_s5 + $0xc8] ss:$16 sps:$4 sm:$0xff]   ;;  %v2067_v56 = vld [vmem:[%s2693_s5 + $0x180] ss:$16 sps:$4 sm:$0xff]  }
  0x32   : > { %942 = vmatpush1.bf16.msra.mxu1 %v1959_v38  ;;  %v2045_v38 = vld [vmem:[%s2693_s5 + $0x104] ss:$16 sps:$4 sm:$0xff]  }
  0x33   : > { %943 = vmatprep.subr.bf16.mxu1 %v1962_v39  ;;  %v2048_v39 = vld [vmem:[%s2693_s5 + $0x10c] ss:$16 sps:$4 sm:$0xff]  }
  0x34   : > { %903 = vmatpush1.bf16.msra.mxu0 %v1946_v36  ;;  %v2037_v36 = vld [vmem:[%s2693_s5 + $0xe0] ss:$16 sps:$4 sm:$0xff]  }
  0x35   : > { %904 = vmatprep.subr.bf16.mxu0 %v1948_v37  ;;  %v2040_v37 = vld [vmem:[%s2693_s5 + $0xe8] ss:$16 sps:$4 sm:$0xff]  }
  0x36   : > { %944 = vmatpush1.bf16.msra.mxu1 %v1965_v44  ;;  %v2049_v44 = vld [vmem:[%s2693_s5 + $0x120] ss:$16 sps:$4 sm:$0xff]  }
  0x37   : > { %945 = vmatprep.subr.bf16.mxu1 %v1968_v46  ;;  %v2057_v46 = vld [vmem:[%s2693_s5 + $0x144] ss:$16 sps:$4 sm:$0xff]  }
  0x38   : > { %905 = vmatpush1.bf16.msra.mxu0 %v1952_v40  ;;  %v2043_v40 = vld [vmem:[%s2693_s5 + $0x100] ss:$16 sps:$4 sm:$0xff]  }
  0x39   : > { %906 = vmatprep.subr.bf16.mxu0 %v1954_v43  ;;  %v2054_v43 = vld [vmem:[%s2693_s5 + $0x12c] ss:$16 sps:$4 sm:$0xff]  }
  0x3a   : > { %946 = vmatpush1.bf16.msra.mxu1 %v1971_v49  ;;  %v2058_v49 = vld [vmem:[%s2693_s5 + $0x148] ss:$16 sps:$4 sm:$0xff]  }
  0x3b   : > { %947 = vmatprep.subr.bf16.mxu1 %v1974_v50  ;;  %v2063_v50 = vld [vmem:[%s2693_s5 + $0x164] ss:$16 sps:$4 sm:$0xff]  }
  0x3c   : > { %907 = vmatpush1.bf16.msra.mxu0 %v1958_v47  ;;  %v2060_v47 = vld [vmem:[%s2693_s5 + $0x14c] ss:$16 sps:$4 sm:$0xff]  }
  0x3d   : > { %908 = vmatprep.subr.bf16.mxu0 %v1960_v48  ;;  %v2055_v48 = vld [vmem:[%s2693_s5 + $0x140] ss:$16 sps:$4 sm:$0xff]  }
  0x3e   : > { %948 = vmatpush1.bf16.msra.mxu1 %v1977_v53  ;;  %v2064_v53 = vld [vmem:[%s2693_s5 + $0x168] ss:$16 sps:$4 sm:$0xff]  }
  0x3f   : > { %949 = vmatprep.subr.bf16.mxu1 %v1980_v54  ;;  %v2069_v54 = vld [vmem:[%s2693_s5 + $0x184] ss:$16 sps:$4 sm:$0xff]  }
  0x40   : > { %909 = vmatpush1.bf16.msra.mxu0 %v1964_v51  ;;  %v2066_v51 = vld [vmem:[%s2693_s5 + $0x16c] ss:$16 sps:$4 sm:$0xff]  }
  0x41   : > { %910 = vmatprep.subr.bf16.mxu0 %v1966_v52  ;;  %v2061_v52 = vld [vmem:[%s2693_s5 + $0x160] ss:$16 sps:$4 sm:$0xff]  }
  0x42   : > { %950 = vmatpush1.bf16.msra.mxu1 %v1983_v59  ;;  %v2075_v59 = vld [vmem:[%s2693_s5 + $0x1a4] ss:$16 sps:$4 sm:$0xff]  }
  0x43   : > { %951 = vmatprep.subr.bf16.mxu1 %v1986_v61  ;;  %v2078_v61 = vld [vmem:[%s2693_s5 + $0x1ac] ss:$16 sps:$4 sm:$0xff]  }
  0x44   : > { %911 = vmatpush1.bf16.msra.mxu0 %v1970_v57  ;;  %v2070_v57 = vld [vmem:[%s2693_s5 + $0x188] ss:$16 sps:$4 sm:$0xff]  }
  0x45   : > { %912 = vmatprep.subr.bf16.mxu0 %v1972_v58  ;;  %v2073_v58 = vld [vmem:[%s2693_s5 + $0x1a0] ss:$16 sps:$4 sm:$0xff]  }
  0x46   : > { %952 = vmatpush1.bf16.msra.mxu1 %v1988_v63  ;;  %v2084_v63 = vld [vmem:[%s2693_s5 + $0x1cc] ss:$16 sps:$4 sm:$0xff]  }
  0x47   : > { %953 = vmatprep.subr.bf16.mxu1 %v1989_v0  ;;  %v2079_v0 = vld [vmem:[%s2693_s5 + $0x1c0] ss:$16 sps:$4 sm:$0xff]  }
  0x48   : > { %913 = vmatpush1.bf16.msra.mxu0 %v1976_v60  ;;  %v2076_v60 = vld [vmem:[%s2693_s5 + $0x1a8] ss:$16 sps:$4 sm:$0xff]  }
  0x49   : > { %914 = vmatprep.subr.bf16.mxu0 %v1978_v62  ;;  %v2081_v62 = vld [vmem:[%s2693_s5 + $0x1c4] ss:$16 sps:$4 sm:$0xff]  }
  0x4a   : > { %954 = vmatpush1.bf16.msra.mxu1 %v1991_v2  ;;  %v1772_v2 = vld [vmem:[%s2688_s0 + $0x8] sm:$0xff] }
  0x4b   : > { %955 = vmatprep.subr.bf16.mxu1 %v1992_v4  ;;  %v2090_v4 = vld [vmem:[%s2693_s5 + $0x1ec] ss:$16 sps:$4 sm:$0xff]  }
  0x4c   : > { %915 = vmatpush1.bf16.msra.mxu0 %v1982_v1  ;;  %v2082_v1 = vld [vmem:[%s2693_s5 + $0x1c8] ss:$16 sps:$4 sm:$0xff]  }
  0x4d   : > { %1412 = vmatprep.subr.bf16.mxu0 %v1997_v3  ;;  %v2087_v3 = vld [vmem:[%s2693_s5 + $0x1e4] ss:$16 sps:$4 sm:$0xff]  }
  0x4e   : > { %956 = vmatpush1.bf16.msra.mxu1 %v1994_v7  ;;  %v2088_v7 = vld [vmem:[%s2693_s5 + $0x1e8] ss:$16 sps:$4 sm:$0xff]  }
  0x4f   : > { %917 = vmatmul.mubr.bf16.vlgmr.msra.gmra.mrb[0].mxu0 %v1703_v6  ;;  %1453 = vmatprep.subr.bf16.mxu1 %v2000_v9 }
  0x50   : > { %1413 = vmatpush1.bf16.msra.mxu0 %v1995_v5  ;;  %v1856_v5 = vpack.c.bf16 %v1772_v2, %v1772_v2 }
  0x51   : > { %1414 = vmatprep.subr.bf16.mxu0 %v2003_v8  ;;  %958 = vmatmul.mubr.bf16.vlgmr.msra.gmra.mrb[0].mxu1 %v1703_v6  ;;  %v2085_v6 = vld [vmem:[%s2693_s5 + $0x1e0] ss:$16 sps:$4 sm:$0xff]   ;;  %v537_v8 = vlaneseq }
  0x52   : > { %1454 = vmatpush1.bf16.msra.mxu1 %v1998_v11  ;;  %1444 = vmatprep.mubr.bf16.mxu0 %v1856_v5  ;;  %v535_v11 = vld [vmem:[%s2692_s4] sm:$0xf] }
  0x53   : > { %1455 = vmatprep.subr.bf16.mxu1 %v2006_v13  ;;  %1485 = vmatprep.mubr.bf16.mxu1 %v1856_v5  ;;  %v2627_v9 = vshrl.u32 %v537_v8, 7 }
  0x54   : > { %1415 = vmatpush1.bf16.msra.mxu0 %v2001_v10 }
  0x55   : > { %1416 = vmatprep.subr.bf16.mxu0 %v2009_v12  ;;  %v539_v10 = vsub.s32 0, %v2627_v9  ;;  %v543_v12 = vsub.s32 1, %v2627_v9 }
  0x56   : > { %1456 = vmatpush1.bf16.msra.mxu1 %v2004_v15  ;;  %v551_v15 = vsub.s32 3, %v2627_v9 }
  0x57   : > { %1457 = vmatprep.subr.bf16.mxu1 %v2012_v17  ;;  %v540_v13 = vrot.slane %v535_v11, %v539_v10 }
  0x58   : > { %1417 = vmatpush1.bf16.msra.mxu0 %v2007_v14  ;;  %v544_v14 = vrot.slane %v535_v11, %v543_v12 }
  0x59   : > { %1418 = vmatprep.subr.bf16.mxu0 %v2015_v16 }
  0x5a   : > { %1458 = vmatpush1.bf16.msra.mxu1 %v2010_v19 }
  0x5b   : > { %1459 = vmatprep.subr.bf16.mxu1 %v2018_v20 }
  0x5c   : > { %1419 = vmatpush1.bf16.msra.mxu0 %v2013_v18 }
  0x5d   : > { %1420 = vmatprep.subr.bf16.mxu0 %v2021_v22 }
  0x5e   : > { %1460 = vmatpush1.bf16.msra.mxu1 %v2016_v21 }
  0x5f   : > { %1461 = vmatprep.subr.bf16.mxu1 %v2024_v23  ;;  %v552_v23 = vrot.slane %v535_v11, %v551_v15 }
  0x60   : > { %1421 = vmatpush1.bf16.msra.mxu0 %v2019_v24 }
  0x61   : > { %1422 = vmatprep.subr.bf16.mxu0 %v2027_v26 }
  0x62   : > { %1462 = vmatpush1.bf16.msra.mxu1 %v2022_v25  ;;  %v547_v25 = vsub.s32 2, %v2627_v9 }
  0x63   : > { %1463 = vmatprep.subr.bf16.mxu1 %v2030_v27 }
  0x64   : > { %1423 = vmatpush1.bf16.msra.mxu0 %v2025_v28 }
  0x65   : > { %1424 = vmatprep.subr.bf16.mxu0 %v2033_v30  ;;  %v548_v30 = vrot.slane %v535_v11, %v547_v25 }
  0x66   : > { %1464 = vmatpush1.bf16.msra.mxu1 %v2028_v29 }
  0x67   : > { %1465 = vmatprep.subr.bf16.mxu1 %v2036_v31 }
  0x68   : > { %1425 = vmatpush1.bf16.msra.mxu0 %v2031_v32 }
  0x69   : > { %1426 = vmatprep.subr.bf16.mxu0 %v2039_v34 }
  0x6a   : > { %1466 = vmatpush1.bf16.msra.mxu1 %v2034_v33 }
  0x6b   : > { %1467 = vmatprep.subr.bf16.mxu1 %v2042_v35 }
  0x6c   : > { %1427 = vmatpush1.bf16.msra.mxu0 %v2037_v36 }
  0x6d   : > { %1428 = vmatprep.subr.bf16.mxu0 %v2045_v38 }
  0x6e   : > { %1468 = vmatpush1.bf16.msra.mxu1 %v2040_v37 }
  0x6f   : > { %1469 = vmatprep.subr.bf16.mxu1 %v2048_v39 }
  0x70   : > { %1429 = vmatpush1.bf16.msra.mxu0 %v2043_v40  ;;  %v470_v40 = vld [vmem:[%s2689_s1] sm:$0xff] }
  0x71   : > { %1430 = vmatprep.subr.bf16.mxu0 %v2051_v42 }
  0x72   : > { %1470 = vmatpush1.bf16.msra.mxu1 %v2046_v41 }
  0x73   : > { %1471 = vmatprep.subr.bf16.mxu1 %v2054_v43 }
  0x74   : > { %1431 = vmatpush1.bf16.msra.mxu0 %v2049_v44 }
  0x75   : > { %1432 = vmatprep.subr.bf16.mxu0 %v2057_v46 }
  0x76   : > { %1472 = vmatpush1.bf16.msra.mxu1 %v2052_v45 }
  0x77   : > { %1473 = vmatprep.subr.bf16.mxu1 %v2060_v47 }
  0x78   : > { %1433 = vmatpush1.bf16.msra.mxu0 %v2055_v48 }
  0x79   : > { %1434 = vmatprep.subr.bf16.mxu0 %v2063_v50 }
  0x7a   : > { %1474 = vmatpush1.bf16.msra.mxu1 %v2058_v49 }
  0x7b   : > { %1475 = vmatprep.subr.bf16.mxu1 %v2066_v51  ;;  %v2131_v51 = vmov -inf  }
  0x7c   : > { %1435 = vmatpush1.bf16.msra.mxu0 %v2061_v52  ;;  %1527 = vst.msk [vmem:[%s2701_s13] sm:$0xff] %vm1526_vm0, %v2131_v51  ;;  %v1063_v52 = vld [vmem:[%s2694_s6] sm:$0xf] }
  0x7d   : > { %1436 = vmatprep.subr.bf16.mxu0 %v2069_v54  ;;  %v1072_v54 = vrot.slane %v1063_v52, %v543_v12  ;;  %v1076_v5 = vrot.slane %v1063_v52, %v547_v25 }
  0x7e   : > { %1476 = vmatpush1.bf16.msra.mxu1 %v2064_v53  ;;  %v1068_v53 = vrot.slane %v1063_v52, %v539_v10 }
  0x7f   : > { %1477 = vmatprep.subr.bf16.mxu1 %v2072_v55 }
  0x80   : > { %1437 = vmatpush1.bf16.msra.mxu0 %v2067_v56 }
  0x81   : > { %1438 = vmatprep.subr.bf16.mxu0 %v2075_v59 }
  0x82   : > { %1478 = vmatpush1.bf16.msra.mxu1 %v2070_v57 }
  0x83   : > { %1479 = vmatprep.subr.bf16.mxu1 %v2078_v61 }
  0x84   : > { %1439 = vmatpush1.bf16.msra.mxu0 %v2073_v58 }
  0x85   : > { %1440 = vmatprep.subr.bf16.mxu0 %v2081_v62 }
  0x86   : > { %1480 = vmatpush1.bf16.msra.mxu1 %v2076_v60 }
  0x87   : > { %1481 = vmatprep.subr.bf16.mxu1 %v2084_v63 }
  0x88   : > { %1441 = vmatpush1.bf16.msra.mxu0 %v2079_v0 }
  0x89   : > { %1442 = vmatprep.subr.bf16.mxu0 %v2087_v3  ;;  %v1080_v3 = vrot.slane %v1063_v52, %v551_v15 }
  0x8a   : > { %1482 = vmatpush1.bf16.msra.mxu1 %v2082_v1 }
  0x8b   : > { %1483 = vmatprep.subr.bf16.mxu1 %v2090_v4 }
  0x8c   : > { %1443 = vmatpush1.bf16.msra.mxu0 %v2085_v6 }
  0x8e   : > { %1484 = vmatpush1.bf16.msra.mxu1 %v2088_v7 }
 0x122   : > { %v918_v16 = vpop.f32.mrb[0].mxu0 }
 0x123   : > { %v919_v17 = vadd.f32 %v918_v16, %v540_v13  ;;  %v920_v18 = vpop.f32.mrb[1].mxu0 }
 0x124   : > { %v921_v19 = vadd.f32 %v920_v18, %v544_v14  ;;  %v922_v20 = vpop.f32.mrb[2].mxu0  ;;  %v959_v26 = vpop.f32.mrb[0].mxu1 }
 0x125   : > { %v1769_v21 = vmul.f32 -1.442695, %v919_v17  ;;  %v923_v22 = vpop.f32.mrb[3].mxu0  ;;  %v961_v27 = vpop.f32.mrb[1].mxu1  ;;  %v960_v33 = vadd.f32 %v959_v26, %v548_v30 }
 0x126   : > { %v1770_v24 = vmul.f32 -1.442695, %v921_v19  ;;  %v962_v28 = vadd.f32 %v961_v27, %v552_v23  ;;  %v963_v29 = vpop.f32.mrb[2].mxu1 }
 0x127   : > { %2091 = vpow2.f32 %v1769_v21  ;;  %v964_v31 = vpop.f32.mrb[3].mxu1 }
 0x128   : > { %2093 = vpow2.f32 %v1770_v24  ;;  %v1771_v32 = vmul.f32 -1.442695, %v962_v28 }
 0x12a   : > { %2095 = vpow2.f32 %v1771_v32 }
 0x12b   : > { %2097 = vtanh.f32 %v960_v33 }
 0x131   : > { %v2092_v34 = vpop.eup %2091 }
 0x132   : > { %v2094_v35 = vpop.eup %2093  ;;  %v969_v36 = vadd.f32 1.0, %v2092_v34 }
 0x133   : > { %v975_v37 = vadd.f32 1.0, %v2094_v35 }
 0x134   : > { %2099 = vrcp.f32 %v969_v36  ;;  %v2096_v38 = vpop.eup %2095 }
 0x135   : > { %2101 = vrcp.f32 %v975_v37  ;;  %v2098_v39 = vpop.eup %2097  ;;  %v982_v42 = vadd.f32 1.0, %v2096_v38 }
 0x137   : > { %2103 = vrcp.f32 %v982_v42 }
 0x13e   : > { %v2100_v41 = vpop.eup %2099 }
 0x13f   : > { %v2102_v43 = vpop.eup %2101  ;;  %v986_v44 = vmul.f32 %v2100_v41, %v2098_v39 }
 0x140   : > { %v985_v45 = vmul.f32 %v2102_v43, %v470_v40 }
 0x141   : > { %v2104_v47 = vpop.eup %2103 }
 0x142   : > { %v987_v46 = vadd.f32 %v986_v44, %v985_v45 }
 0x144   : > { %2105 = vtanh.f32 %v987_v46  ;;  %1521 = vst [vmem:[%s2700_s12] sm:$0xff] %v987_v46 }
 0x14b   : > { %v1773_v9 = vld [vmem:[%s2689_s1 + $0x8] sm:$0xff] }
 0x14e   : > { %v2106_v48 = vpop.eup %2105 }
 0x14f   : > { %v989_v49 = vmul.f32 %v2106_v48, %v2104_v47 }
 0x151   : > { %v1855_v50 = vpack.c.bf16 %v989_v49, %v989_v49  ;;  %1518 = vst [vmem:[%s2699_s11] sm:$0xff] %v989_v49 }
 0x153   : > { %1445 = vmatmul.mubr.bf16.vlgmr.msra.gmra.mrb[4].mxu0 %v1855_v50  ;;  %1486 = vmatmul.mubr.bf16.vlgmr.msra.gmra.mrb[4].mxu1 %v1855_v50 }
 0x226   : > { %v1446_v55 = vpop.f32.mrb[4].mxu0  ;;  %v1487_v56 = vpop.f32.mrb[4].mxu1 }
 0x227   : > { %v1447_v57 = vadd.f32 %v1446_v55, %v1068_v53  ;;  %v1448_v58 = vpop.f32.mrb[5].mxu0  ;;  %v1489_v59 = vpop.f32.mrb[5].mxu1  ;;  %v1488_v7 = vadd.f32 %v1487_v56, %v1076_v5 }
 0x228   : > { %v1449_v60 = vadd.f32 %v1448_v58, %v1072_v54  ;;  %v1450_v61 = vpop.f32.mrb[6].mxu0  ;;  %v1491_v62 = vpop.f32.mrb[6].mxu1  ;;  %v1490_v4 = vadd.f32 %v1489_v59, %v1080_v3 }
 0x229   : > { %v1840_v63 = vmul.f32 -1.442695, %v1447_v57  ;;  %v1451_v0 = vpop.f32.mrb[7].mxu0  ;;  %v1492_v1 = vpop.f32.mrb[7].mxu1 }
 0x22a   : > { %v1841_v2 = vmul.f32 -1.442695, %v1449_v60  ;;  %v1842_v6 = vmul.f32 -1.442695, %v1490_v4 }
 0x22b   : > { %2107 = vpow2.f32 %v1840_v63 }
 0x22c   : > { %2109 = vpow2.f32 %v1841_v2 }
 0x22d   : > { %2111 = vpow2.f32 %v1842_v6 }
 0x22e   : > { %2113 = vtanh.f32 %v1488_v7 }
 0x235   : > { %v2108_v8 = vpop.eup %2107 }
 0x236   : > { %v2110_v10 = vpop.eup %2109  ;;  %v1497_v11 = vadd.f32 1.0, %v2108_v8 }
 0x237   : > { %v1503_v12 = vadd.f32 1.0, %v2110_v10  ;;  %v2112_v13 = vpop.eup %2111 }
 0x238   : > { %2115 = vrcp.f32 %v1497_v11  ;;  %v2114_v14 = vpop.eup %2113  ;;  %v1510_v18 = vadd.f32 1.0, %v2112_v13 }
 0x239   : > { %2117 = vrcp.f32 %v1503_v12 }
 0x23a   : > { %2119 = vrcp.f32 %v1510_v18 }
 0x242   : > { %v2116_v15 = vpop.eup %2115 }
 0x243   : > { %v2118_v16 = vpop.eup %2117  ;;  %v1514_v17 = vmul.f32 %v2116_v15, %v2114_v14 }
 0x244   : > { %v1513_v19 = vmul.f32 %v2118_v16, %v1773_v9  ;;  %v2120_v21 = vpop.eup %2119 }
 0x246   : > { %v1515_v20 = vadd.f32 %v1514_v17, %v1513_v19 }
 0x248   : > { %2121 = vtanh.f32 %v1515_v20  ;;  %1844 = vst [vmem:[%s2700_s12 + $0x8] sm:$0xff] %v1515_v20 }
 0x252   : > { %v2122_v22 = vpop.eup %2121 }
 0x253   : > { %v1517_v23 = vmul.f32 %v2122_v22, %v2120_v21 }
 0x255   : > { %1843 = vst [vmem:[%s2699_s11 + $0x8] sm:$0xff] %v1517_v23  ;;  %v1524_v24 = vpack.c.bf16 %v1517_v23, %v1517_v23 }
 0x257   : > { %1525 = vst [vmem:[#allocation4] sm:$0xf] %v1524_v24 }
 0x258 PF: > { %v1528_v25 = vld [vmem:[%s2222_s17] sm:$0xff]  ;;  %v2132_v26 = vmov 0.0   ;;  %vm2133_vm1 = vmmov 0   ;;  %v1529_v29 = vld [vmem:[%s2222_s17 + $0x8] sm:$0xff]  ;;  %v1530_v32 = vld [vmem:[%s2222_s17 + $0x10] sm:$0xff]  ;;  %vm1603_vm2 = vcmask 7168  }
 0x259   : > { %1866 = vmatprep.subr.bf16.mxu0 %v2132_v26  ;;  %v1532_v27 = vunpack.c.l.s8.bf16 %v1528_v25  ;;  %1882 = vmatprep.mubr.msk.bf16.mxu0 %vm2133_vm1, %v2132_v26  ;;  %v1533_v28 = vunpack.c.h.s8.bf16 %v1528_v25  ;;  %v1534_v30 = vunpack.c.l.s8.bf16 %v1529_v29  ;;  %v1535_v31 = vunpack.c.h.s8.bf16 %v1529_v29  ;;  %v1531_v35 = vld [vmem:[%s2222_s17 + $0x18] sm:$0xff]  ;;  %v1845_v39 = vld [vmem:[%s451_s14] ss:$0 sm:$0xff] }
 0x25a   : > { %v1536_v33 = vunpack.c.l.s8.bf16 %v1530_v32  ;;  %v1537_v34 = vunpack.c.h.s8.bf16 %v1530_v32  ;;  %v1538_v36 = vunpack.c.l.s8.bf16 %v1531_v35  ;;  %v1539_v37 = vunpack.c.h.s8.bf16 %v1531_v35  ;;  %v1846_v41 = vld [vmem:[%s454_s20] ss:$0 sm:$0xff] }
 0x25b   : > { %1867 = vmatpush3.bf16.msra.mxu0 %v1532_v27  ;;  %v1599_v48 = vld [vmem:[%s2701_s13] sm:$0xff] }
 0x25c   : > { %1868 = vmatprep.subr.bf16.mxu0 %v2132_v26 }
 0x25e   : > { %v1540_v38 = vld [vmem:[#allocation4] sm:$0xf] }
 0x25f   : > { %1869 = vmatpush3.bf16.msra.mxu0 %v1533_v28 }
 0x260   : > { %1870 = vmatprep.subr.bf16.mxu0 %v2132_v26 }
 0x263   : > { %1871 = vmatpush3.bf16.msra.mxu0 %v1534_v30 }
 0x264   : > { %1872 = vmatprep.subr.bf16.mxu0 %v2132_v26 }
 0x267   : > { %1873 = vmatpush3.bf16.msra.mxu0 %v1535_v31 }
 0x268   : > { %1874 = vmatprep.subr.bf16.mxu0 %v2132_v26 }
 0x26b   : > { %1875 = vmatpush3.bf16.msra.mxu0 %v1536_v33 }
 0x26c   : > { %1876 = vmatprep.subr.bf16.mxu0 %v2132_v26 }
 0x26f   : > { %1877 = vmatpush3.bf16.msra.mxu0 %v1537_v34 }
 0x270   : > { %1878 = vmatprep.subr.bf16.mxu0 %v2132_v26 }
 0x273   : > { %1879 = vmatpush3.bf16.msra.mxu0 %v1538_v36 }
 0x274   : > { %1880 = vmatprep.subr.bf16.mxu0 %v2132_v26 }
 0x277   : > { %1881 = vmatpush3.bf16.msra.mxu0 %v1539_v37 }
 0x27a   : > { %1883 = vmatmul.mubr.bf16.vlgmr.msra.gmra.mrb[0].mxu0 %v1540_v38 }
 0x34d   : > { %v1575_v40 = vpop.f32.mrb[0].mxu0 }
 0x34e   : > { %v1588_v42 = vmul.f32 %v1845_v39, %v1575_v40  ;;  %v1884_v43 = vpop.f32.mrb[1].mxu0 }
 0x34f   : > { %v1578_v44 = vpop.f32.mrb[2].mxu0 }
 0x350   : > { %v1885_v45 = vpop.f32.mrb[3].mxu0  ;;  %v1596_v46 = vadd.f32 %v1846_v41, %v1588_v42 }
 0x352   : > { %v1597_v47 = vpack.c.bf16 %v1596_v46, %v1596_v46  ;;  %1600 = vmax.xlane.f32.xlu0 %v1596_v46 }
 0x354   : > { %1598 = vst [vmem:[%s2232_s24] sm:$0xf] %v1597_v47 }
 0x3df   : > { %v1601_v49 = vpop.xlane.xlu0 %1600 }
 0x3e0   : > { %v1602_v50 = vmax.f32 %v1599_v48, %v1601_v49 }
 0x3e2   : > { %1604 = vst.msk [vmem:[%s2701_s13] sm:$0xff] %vm1603_vm2, %v1602_v50 }
 0x3e3 PF: > { %s2704_s27 = sld [smem:[#allocation5_spill]] }
 0x3e9   : > { %s24_s25 = sadd.s32 1, %s2704_s27  }
 0x3ea   : > { %p21_p5 = scmp.ge.s32.totalorder %s24_s25, 4  }
 0x3ec   :  { %23 = sbr.rel (!%p21_p5) target bundleno = 1 (0x1), region = 128 }

</bundles_post_ra>
